<compile_context>
chip_gen: v6e
topology: v6e:2x2x1
jax: 0.10.0
libtpu: 0.0.40
codegen_flags: <defaults>
</compile_context>

<pallas_src>
import functools

import numpy as np

import jax
import jax.numpy as jnp
from jax.experimental import pallas as pl
from jax.experimental.pallas import tpu as pltpu

layer_list = ['conv1', 'bn1', 'relu', 'maxpool',
              'layer1', 'layer2', 'layer3', 'layer4', 'avgpool']

_BN_EPS = 1e-5
_COMPILER = pltpu.CompilerParams(dimension_semantics=("parallel",))


# --------------------------------------------------------------------------
# Fused kernel: conv1 -> bn1 -> relu -> maxpool -> layer1..4 -> avgpool
# --------------------------------------------------------------------------

def _fused_backbone_kernel(x_ref, w1_ref, b1_ref, s1_ref, t1_ref,
                           wl_ref, bl_ref,
                           conv1_ref, bn1_ref, relu_ref, mp_ref,
                           l1_ref, l2_ref, l3_ref, l4_ref, avg_ref,
                           *, H, W, Cin, C, n_layers, mxu_dtype):
    f32 = jnp.float32
    WC = W * C                     # 128 : conv1/bn1/relu lane width
    Ho, Wo = H // 2, W // 2
    Hq = Ho // 2                   # supertile rows (2 output rows / sublane)
    WoC = Wo * C                   # 64

    # ---------------- conv1 + bn1 + relu : ONE banded matmul ---------------
    # LHS row h = [x(h-1) | x(h) | x(h+1)]; border rows are zero; width
    # borders are handled inside the banded RHS (no padded copy ever built).
    x = x_ref[0]                                            # (H, W*Cin)
    zx = jnp.zeros((1, W * Cin), f32)
    up = jnp.concatenate([zx, x[0:H - 1]], axis=0)          # rows h-1
    dn = jnp.concatenate([x[1:H], zx], axis=0)              # rows h+1
    lhs1 = jnp.concatenate([up, x, dn], axis=1)             # (H, 3*W*Cin)
    conv = jnp.dot(lhs1.astype(mxu_dtype), w1_ref[...],
                   preferred_element_type=f32) + b1_ref[...]   # (H, W*C)
    bn = conv * s1_ref[...] + t1_ref[...]
    relu = jnp.maximum(bn, 0.0)
    conv1_ref[0] = conv.astype(conv1_ref.dtype)
    bn1_ref[0] = bn.astype(bn1_ref.dtype)
    relu_ref[0] = relu.astype(relu_ref.dtype)

    # ---------------- maxpool 2x2 / stride 2 (conv1 epilogue) --------------
    # Produce the pooled activation directly as (even rows, odd rows) pieces
    # so both the store and the layer matmul LHS are row-packed / lane-dense.
    rows = [relu[h:h + 1, :] for h in range(H)]
    rmax = [jnp.maximum(rows[2 * k], rows[2 * k + 1]) for k in range(Ho)]
    rm_even = jnp.concatenate(rmax[0::2], axis=0)           # pooled rows 0,2,..
    rm_odd = jnp.concatenate(rmax[1::2], axis=0)            # pooled rows 1,3,..

    def _colpair_max(v):                                    # (Hq, W*C)->(Hq, Wo*C)
        evn = jnp.concatenate([v[:, (2 * i) * C:(2 * i + 1) * C]
                               for i in range(Wo)], axis=1)
        odd = jnp.concatenate([v[:, (2 * i + 1) * C:(2 * i + 2) * C]
                               for i in range(Wo)], axis=1)
        return jnp.maximum(evn, odd)

    act_even = _colpair_max(rm_even)                        # pooled rows 0,2,4,6
    act_odd = _colpair_max(rm_odd)                          # pooled rows 1,3,5,7
    mp_ref[0] = jnp.concatenate([act_even, act_odd],
                                axis=1).astype(mp_ref.dtype)   # (Hq, 2*Wo*C)

    # ---------------- layer1..layer4 (BN folded, ReLU fused) ---------------
    # Supertile t covers output rows (2t, 2t+1); its LHS row concatenates the
    # input rows 2t-1 .. 2t+2 (zero rows at the border).  One matmul per
    # layer; output columns are row-packed -> (Hq, 128) lane-dense store.
    zrow = jnp.zeros((1, WoC), f32)
    layer_refs = (l1_ref, l2_ref, l3_ref, l4_ref)
    out = None
    for i in range(n_layers):
        g0 = jnp.concatenate([zrow, act_odd[0:Hq - 1]], axis=0)    # rows 2t-1
        g3 = jnp.concatenate([act_even[1:Hq], zrow], axis=0)       # rows 2t+2
        lhs = jnp.concatenate([g0, act_even, act_odd, g3],
                              axis=1)                              # (Hq, 4*Wo*C)
        out = jnp.dot(lhs.astype(mxu_dtype), wl_ref[i],
                      preferred_element_type=f32)                  # (Hq, 2*Wo*C)
        out = jnp.maximum(out + bl_ref[i], 0.0)
        layer_refs[i][0] = out.astype(layer_refs[i].dtype)
        act_even = out[:, 0:WoC]                                   # rows 2t
        act_odd = out[:, WoC:2 * WoC]                              # rows 2t+1

    # ---------------- global average pool (layer4 still in vregs) ----------
    colsum = jnp.sum(out, axis=0, keepdims=True)                   # (1, 2*Wo*C)
    acc = colsum[:, 0:C]
    for j in range(1, 2 * Wo):
        acc = acc + colsum[:, j * C:(j + 1) * C]
    avg_ref[0] = (acc * (1.0 / (Ho * Wo))).astype(avg_ref.dtype)   # (1, C)


def _fused_forward(x_slab, w1b, b1t, s1t, t1t, wlb, blt, *, H, W, Cin, C):
    N = x_slab.shape[0]
    WC = W * C
    Ho, Wo = H // 2, W // 2
    Hq = Ho // 2
    n_layers = wlb.shape[0]

    kern = functools.partial(_fused_backbone_kernel, H=H, W=W, Cin=Cin, C=C,
                             n_layers=n_layers, mxu_dtype=wlb.dtype)

    slab16 = jax.ShapeDtypeStruct((N, H, WC), jnp.float32)
    slab4 = jax.ShapeDtypeStruct((N, Hq, 2 * Wo * C), jnp.float32)
    out_shape = (slab16, slab16, slab16,                 # conv1, bn1, relu
                 slab4, slab4, slab4, slab4, slab4,      # maxpool, layer1..4
                 jax.ShapeDtypeStruct((N, 1, C), jnp.float32))   # avgpool

    spec16 = pl.BlockSpec((1, H, WC), lambda n: (n, 0, 0))
    spec4 = pl.BlockSpec((1, Hq, 2 * Wo * C), lambda n: (n, 0, 0))

    in_specs = [
        pl.BlockSpec((1, H, W * Cin), lambda n: (n, 0, 0)),
        # grid-invariant parameters (constant block index -> DMA'd once):
        pl.BlockSpec(w1b.shape, lambda n: (0, 0)),
        pl.BlockSpec(b1t.shape, lambda n: (0, 0)),
        pl.BlockSpec(s1t.shape, lambda n: (0, 0)),
        pl.BlockSpec(t1t.shape, lambda n: (0, 0)),
        pl.BlockSpec(wlb.shape, lambda n: (0, 0, 0)),
        pl.BlockSpec(blt.shape, lambda n: (0, 0, 0)),
    ]
    out_specs = [spec16, spec16, spec16,
                 spec4, spec4, spec4, spec4, spec4,
                 pl.BlockSpec((1, 1, C), lambda n: (n, 0, 0))]

    return pl.pallas_call(
        kern,
        out_shape=out_shape,
        grid=(N,),
        in_specs=in_specs,
        out_specs=out_specs,
        compiler_params=_COMPILER,
    )(x_slab, w1b, b1t, s1t, t1t, wlb, blt)


# --------------------------------------------------------------------------
# Parameter construction (deterministic synthetic backbone), banding, folding
# --------------------------------------------------------------------------

def _conv_params(key, k, cin, cout):
    kw_, kb_ = jax.random.split(key)
    w = 0.1 * jax.random.normal(kw_, (k, k, cin, cout), jnp.float32)
    b = 0.01 * jax.random.normal(kb_, (cout,), jnp.float32)
    return w, b


def _bn_params(key, c):
    k1, k2, k3, k4 = jax.random.split(key, 4)
    gamma = 1.0 + 0.1 * jax.random.normal(k1, (c,), jnp.float32)
    beta = 0.1 * jax.random.normal(k2, (c,), jnp.float32)
    mean = 0.1 * jax.random.normal(k3, (c,), jnp.float32)
    var = 1.0 + 0.1 * jax.random.uniform(k4, (c,), jnp.float32)
    return gamma, beta, mean, var


def _band_conv_rows(w, w_out):
    """(K,K,Cin,Cout) -> (K*w_out*Cin, w_out*Cout) banded same-pad conv RHS.

    One matmul per image computes the whole conv: LHS row h is
    [row(h-1)|row(h)|row(h+1)] (zero rows at the border, built in-kernel);
    width-border taps are simply absent from the band (acts as zero padding).
    """
    K, _, cin, cout = w.shape
    wnp = np.asarray(w, np.float32)
    out = np.zeros((K * w_out * cin, w_out * cout), np.float32)
    for kh in range(K):
        for kw in range(K):
            for wo in range(w_out):
                wi = wo + kw - 1
                if 0 <= wi < w_out:
                    r = kh * w_out * cin + wi * cin
                    c_ = wo * cout
                    out[r:r + cin, c_:c_ + cout] = wnp[kh, kw]
    return out


def _band_conv_row_pairs(w, w_out):
    """(K,K,C,C) -> (4*w_out*C, 2*w_out*C) supertile (2 output rows) RHS.

    Supertile t covers output rows (2t, 2t+1); its LHS concatenates input
    rows 2t-1..2t+2.  Output columns are row-packed (d, wo, co), so the
    stored activation slab is lane-dense (2*w_out*C = 128).
    """
    K, _, cin, cout = w.shape
    wnp = np.asarray(w, np.float32)
    out = np.zeros((4 * w_out * cin, 2 * w_out * cout), np.float32)
    for d in range(2):
        for kh in range(K):
            g = d + kh                       # LHS segment holding row 2t-1+g
            for kw in range(K):
                for wo in range(w_out):
                    wi = wo + kw - 1
                    if 0 <= wi < w_out:
                        r = g * w_out * cin + wi * cin
                        c_ = d * w_out * cout + wo * cout
                        out[r:r + cin, c_:c_ + cout] = wnp[kh, kw]
    return out


class ActivationMapExtractor:
    """JAX/Pallas port of the PyTorch ActivationMapExtractor forward pass."""

    def __init__(self, kernel_params, dims, extracted_layers):
        self.kernel_params = kernel_params
        self.dims = dims                       # (H, W, Cin, C)
        self.extracted_layers = extracted_layers

    def forward(self, x):
        # x: NCHW (PyTorch convention)
        H, W, Cin, C = self.dims
        N = x.shape[0]
        Ho, Wo = H // 2, W // 2
        x_slab = jnp.transpose(x, (0, 2, 3, 1)).reshape(N, H, W * Cin)
        (conv1, bn1, relu, mp, l1, l2, l3, l4, avg) = _fused_forward(
            x_slab, *self.kernel_params, H=H, W=W, Cin=Cin, C=C)

        def nchw(slab, h, w):
            return jnp.transpose(slab.reshape(N, h, w, C), (0, 3, 1, 2))

        all_maps = {
            'conv1': nchw(conv1, H, W), 'bn1': nchw(bn1, H, W),
            'relu': nchw(relu, H, W), 'maxpool': nchw(mp, Ho, Wo),
            'layer1': nchw(l1, Ho, Wo), 'layer2': nchw(l2, Ho, Wo),
            'layer3': nchw(l3, Ho, Wo), 'layer4': nchw(l4, Ho, Wo),
            'avgpool': nchw(avg, 1, 1),
        }
        outputs = {}
        for name in layer_list:
            if self.extracted_layers is None or (
                    name in self.extracted_layers and 'fc' not in name):
                outputs[name] = all_maps[name]
        return outputs


def build_extractor(key, cin=4, c=8, H=16, W=16, extracted_layers=None,
                    mxu_dtype=jnp.bfloat16, n_layers=4):
    assert W * c == 128 and H % 4 == 0 and W % 2 == 0      # lane-dense slabs
    keys = jax.random.split(key, 2 + 2 * n_layers)
    w1, b1 = _conv_params(keys[0], 3, cin, c)
    bn1 = _bn_params(keys[1], c)
    blocks = []
    for i in range(n_layers):
        wl, bl = _conv_params(keys[2 + 2 * i], 3, c, c)
        bnl = _bn_params(keys[3 + 2 * i], c)
        blocks.append((wl, bl, bnl))

    Wo = W // 2

    # conv1 banded RHS (bf16 for the MXU); bias / bn1 scale+shift lane-tiled.
    w1b = jnp.asarray(_band_conv_rows(w1, W), mxu_dtype)            # (192,128)
    b1t = jnp.tile(b1, W).reshape(1, W * c)
    g, be, m, v = bn1
    s1 = g * jax.lax.rsqrt(v + _BN_EPS)
    t1 = be - m * s1
    s1t = jnp.tile(s1, W).reshape(1, W * c)
    t1t = jnp.tile(t1, W).reshape(1, W * c)

    # layer1..4: fold eval-mode BN into conv weights/bias, band for supertile.
    wl_list, bl_list = [], []
    for (wl, bl, (g2, be2, m2, v2)) in blocks:
        s2 = g2 * jax.lax.rsqrt(v2 + _BN_EPS)
        w_fold = wl * s2[None, None, None, :]
        b_fold = (bl - m2) * s2 + be2
        wl_list.append(_band_conv_row_pairs(w_fold, Wo))            # (256,128)
        bl_list.append(np.tile(np.asarray(b_fold, np.float32), 2 * Wo))
    wlb = jnp.asarray(np.stack(wl_list), mxu_dtype)                 # (4,256,128)
    blt = jnp.asarray(np.stack(bl_list)[:, None, :], jnp.float32)   # (4,1,128)

    kernel_params = (w1b, b1t, s1t, t1t, wlb, blt)
    raw_params = dict(conv1=(w1, b1), bn1=bn1, blocks=blocks)
    model = ActivationMapExtractor(kernel_params, (H, W, cin, c),
                                   extracted_layers)
    return model, raw_params


# --------------------------------------------------------------------------
# Pure-jnp f32 reference (correctness check only)
# --------------------------------------------------------------------------

def _ref_conv(x, w, b):
    y = jax.lax.conv_general_dilated(
        x, w, (1, 1), 'SAME', dimension_numbers=('NHWC', 'HWIO', 'NHWC'))
    return y + b


def _ref_bn(x, g, be, m, v, eps=_BN_EPS):
    return (x - m) * jax.lax.rsqrt(v + eps) * g + be


def _ref_maxpool(x):
    N, H, W, C = x.shape
    return jnp.max(x.reshape(N, H // 2, 2, W // 2, 2, C), axis=(2, 4))


def ref_forward(x_nchw, params):
    h = jnp.transpose(x_nchw, (0, 2, 3, 1))
    outs = {}
    w1, b1 = params['conv1']
    g, be, m, v = params['bn1']
    c1 = _ref_conv(h, w1, b1); outs['conv1'] = c1
    bn = _ref_bn(c1, g, be, m, v); outs['bn1'] = bn
    r = jnp.maximum(bn, 0.0); outs['relu'] = r
    h = _ref_maxpool(r); outs['maxpool'] = h
    for i, (wl, bl, (g2, be2, m2, v2)) in enumerate(params['blocks']):
        h = jnp.maximum(_ref_bn(_ref_conv(h, wl, bl), g2, be2, m2, v2), 0.0)
        outs[f'layer{i + 1}'] = h
    outs['avgpool'] = jnp.mean(h, axis=(1, 2), keepdims=True)
    return {k: jnp.transpose(a, (0, 3, 1, 2)) for k, a in outs.items()}


# --------------------------------------------------------------------------

if __name__ == "__main__":
    key = jax.random.PRNGKey(0)
    kx, kp = jax.random.split(key)

    # NCHW input, like the PyTorch module expects.
    x = jax.random.normal(kx, (2, 4, 16, 16), jnp.float32)

    model, raw = build_extractor(kp, cin=4, c=8, H=16, W=16,
                                 extracted_layers=None)
    fwd = jax.jit(model.forward)
    outs = jax.block_until_ready(fwd(x))

    # shape / key sanity checks
    assert set(outs.keys()) == set(layer_list)
    assert outs['conv1'].shape == (2, 8, 16, 16)
    assert outs['bn1'].shape == (2, 8, 16, 16)
    assert outs['relu'].shape == (2, 8, 16, 16)
    assert outs['maxpool'].shape == (2, 8, 8, 8)
    assert outs['layer1'].shape == (2, 8, 8, 8)
    assert outs['layer4'].shape == (2, 8, 8, 8)
    assert outs['avgpool'].shape == (2, 8, 1, 1)
    assert all(bool(jnp.all(jnp.isfinite(v))) for v in outs.values())

    # Numerical check against a pure-jnp f32 reference.  The kernel feeds the
    # MXU bf16 operands (f32 accumulation), hence the loosened tolerance; a
    # genuine banding/folding/pooling bug produces O(0.1..1) errors.
    ref = ref_forward(x, raw)
    for name in layer_list:
        assert bool(jnp.allclose(outs[name], ref[name],
                                 atol=5e-2, rtol=5e-2)), name

    print("KERNEL_OK")
</pallas_src>

<mosaic_0001>
module attributes {stable_mosaic.version = 11 : i64} {
  func.func @_fused_backbone_kernel(%arg0: i32, %arg1: memref<1x16x64xf32, #tpu.memory_space<vmem>>, %arg2: memref<192x128xbf16, #tpu.memory_space<vmem>>, %arg3: memref<1x128xf32, #tpu.memory_space<vmem>>, %arg4: memref<1x128xf32, #tpu.memory_space<vmem>>, %arg5: memref<1x128xf32, #tpu.memory_space<vmem>>, %arg6: memref<4x256x128xbf16, #tpu.memory_space<vmem>>, %arg7: memref<4x1x128xf32, #tpu.memory_space<vmem>>, %arg8: memref<1x16x128xf32, #tpu.memory_space<vmem>>, %arg9: memref<1x16x128xf32, #tpu.memory_space<vmem>>, %arg10: memref<1x16x128xf32, #tpu.memory_space<vmem>>, %arg11: memref<1x4x128xf32, #tpu.memory_space<vmem>>, %arg12: memref<1x4x128xf32, #tpu.memory_space<vmem>>, %arg13: memref<1x4x128xf32, #tpu.memory_space<vmem>>, %arg14: memref<1x4x128xf32, #tpu.memory_space<vmem>>, %arg15: memref<1x4x128xf32, #tpu.memory_space<vmem>>, %arg16: memref<1x1x8xf32, #tpu.memory_space<vmem>>) attributes {dimension_semantics = [#tpu.dimension_semantics<parallel>], iteration_bounds = array<i64: 2>, scalar_prefetch = 0 : i64, scratch_operands = 0 : i64, tpu.core_type = #tpu.core_type<tc>, window_params = [{transform_indices = @transform_0, window_bounds = array<i64: 1, 16, 64>}, {pipeline_mode = #tpu.pipeline_mode<synchronous>, transform_indices = @transform_1, window_bounds = array<i64: 192, 128>}, {pipeline_mode = #tpu.pipeline_mode<synchronous>, transform_indices = @transform_2, window_bounds = array<i64: 1, 128>}, {pipeline_mode = #tpu.pipeline_mode<synchronous>, transform_indices = @transform_3, window_bounds = array<i64: 1, 128>}, {pipeline_mode = #tpu.pipeline_mode<synchronous>, transform_indices = @transform_4, window_bounds = array<i64: 1, 128>}, {pipeline_mode = #tpu.pipeline_mode<synchronous>, transform_indices = @transform_5, window_bounds = array<i64: 4, 256, 128>}, {pipeline_mode = #tpu.pipeline_mode<synchronous>, transform_indices = @transform_6, window_bounds = array<i64: 4, 1, 128>}, {transform_indices = @transform_7, window_bounds = array<i64: 1, 16, 128>}, {transform_indices = @transform_8, window_bounds = array<i64: 1, 16, 128>}, {transform_indices = @transform_9, window_bounds = array<i64: 1, 16, 128>}, {transform_indices = @transform_10, window_bounds = array<i64: 1, 4, 128>}, {transform_indices = @transform_11, window_bounds = array<i64: 1, 4, 128>}, {transform_indices = @transform_12, window_bounds = array<i64: 1, 4, 128>}, {transform_indices = @transform_13, window_bounds = array<i64: 1, 4, 128>}, {transform_indices = @transform_14, window_bounds = array<i64: 1, 4, 128>}, {transform_indices = @transform_15, window_bounds = array<i64: 1, 1, 8>}]} {
    %c0 = arith.constant 0 : index
    %c0_0 = arith.constant 0 : index
    %c0_1 = arith.constant 0 : index
    %0 = vector.load %arg1[%c0, %c0_0, %c0_1] : memref<1x16x64xf32, #tpu.memory_space<vmem>>, vector<1x16x64xf32>
    %1 = vector.shape_cast %0 : vector<1x16x64xf32> to vector<16x64xf32>
    %cst = arith.constant 0.000000e+00 : f32
    %2 = vector.broadcast %cst : f32 to vector<1x64xf32>
    %3 = vector.extract_strided_slice %1 {offsets = [0, 0], sizes = [15, 64], strides = [1, 1]} : vector<16x64xf32> to vector<15x64xf32>
    %4 = tpu.concatenate %2, %3 in 0 : vector<1x64xf32>, vector<15x64xf32> -> vector<16x64xf32>
    %5 = vector.extract_strided_slice %1 {offsets = [1, 0], sizes = [15, 64], strides = [1, 1]} : vector<16x64xf32> to vector<15x64xf32>
    %6 = tpu.concatenate %5, %2 in 0 : vector<15x64xf32>, vector<1x64xf32> -> vector<16x64xf32>
    %7 = tpu.concatenate %4, %1, %6 in 1 : vector<16x64xf32>, vector<16x64xf32>, vector<16x64xf32> -> vector<16x192xf32>
    %8 = arith.truncf %7 : vector<16x192xf32> to vector<16x192xbf16>
    %c0_2 = arith.constant 0 : index
    %c0_3 = arith.constant 0 : index
    %9 = vector.load %arg2[%c0_2, %c0_3] : memref<192x128xbf16, #tpu.memory_space<vmem>>, vector<192x128xbf16>
    %cst_4 = arith.constant dense<0.000000e+00> : vector<16x128xf32>
    %10 = tpu.matmul %8, %9, %cst_4 {dimension_numbers = #tpu.dot_dimension_numbers<[1], [0], [0], [1], [0, 0, 1, 1], [], []>} : vector<16x192xbf16>, vector<192x128xbf16>, vector<16x128xf32> -> vector<16x128xf32>
    %c0_5 = arith.constant 0 : index
    %c0_6 = arith.constant 0 : index
    %11 = vector.load %arg3[%c0_5, %c0_6] : memref<1x128xf32, #tpu.memory_space<vmem>>, vector<1x128xf32>
    %12 = vector.broadcast %11 : vector<1x128xf32> to vector<16x128xf32>
    %13 = arith.addf %10, %12 : vector<16x128xf32>
    %c0_7 = arith.constant 0 : index
    %c0_8 = arith.constant 0 : index
    %14 = vector.load %arg4[%c0_7, %c0_8] : memref<1x128xf32, #tpu.memory_space<vmem>>, vector<1x128xf32>
    %15 = vector.broadcast %14 : vector<1x128xf32> to vector<16x128xf32>
    %16 = arith.mulf %13, %15 : vector<16x128xf32>
    %c0_9 = arith.constant 0 : index
    %c0_10 = arith.constant 0 : index
    %17 = vector.load %arg5[%c0_9, %c0_10] : memref<1x128xf32, #tpu.memory_space<vmem>>, vector<1x128xf32>
    %18 = vector.broadcast %17 : vector<1x128xf32> to vector<16x128xf32>
    %19 = arith.addf %16, %18 : vector<16x128xf32>
    %cst_11 = arith.constant 0.000000e+00 : f32
    %20 = vector.broadcast %cst_11 : f32 to vector<16x128xf32>
    %21 = arith.maximumf %19, %20 : vector<16x128xf32>
    %c0_12 = arith.constant 0 : index
    %c0_13 = arith.constant 0 : index
    %c0_14 = arith.constant 0 : index
    %22 = vector.load %arg8[%c0_12, %c0_13, %c0_14] : memref<1x16x128xf32, #tpu.memory_space<vmem>>, vector<1x16x128xf32>
    %23 = vector.shape_cast %22 : vector<1x16x128xf32> to vector<16x128xf32>
    %24 = vector.shape_cast %13 : vector<16x128xf32> to vector<1x16x128xf32>
    tpu.vector_store %arg8[%c0_12, %c0_13, %c0_14], %24 {strides = array<i32>} : memref<1x16x128xf32, #tpu.memory_space<vmem>>, vector<1x16x128xf32>,
    %c0_15 = arith.constant 0 : index
    %c0_16 = arith.constant 0 : index
    %c0_17 = arith.constant 0 : index
    %25 = vector.load %arg9[%c0_15, %c0_16, %c0_17] : memref<1x16x128xf32, #tpu.memory_space<vmem>>, vector<1x16x128xf32>
    %26 = vector.shape_cast %25 : vector<1x16x128xf32> to vector<16x128xf32>
    %27 = vector.shape_cast %19 : vector<16x128xf32> to vector<1x16x128xf32>
    tpu.vector_store %arg9[%c0_15, %c0_16, %c0_17], %27 {strides = array<i32>} : memref<1x16x128xf32, #tpu.memory_space<vmem>>, vector<1x16x128xf32>,
    %c0_18 = arith.constant 0 : index
    %c0_19 = arith.constant 0 : index
    %c0_20 = arith.constant 0 : index
    %28 = vector.load %arg10[%c0_18, %c0_19, %c0_20] : memref<1x16x128xf32, #tpu.memory_space<vmem>>, vector<1x16x128xf32>
    %29 = vector.shape_cast %28 : vector<1x16x128xf32> to vector<16x128xf32>
    %30 = vector.shape_cast %21 : vector<16x128xf32> to vector<1x16x128xf32>
    tpu.vector_store %arg10[%c0_18, %c0_19, %c0_20], %30 {strides = array<i32>} : memref<1x16x128xf32, #tpu.memory_space<vmem>>, vector<1x16x128xf32>,
    %31 = vector.extract_strided_slice %21 {offsets = [0, 0], sizes = [1, 128], strides = [1, 1]} : vector<16x128xf32> to vector<1x128xf32>
    %32 = vector.extract_strided_slice %21 {offsets = [1, 0], sizes = [1, 128], strides = [1, 1]} : vector<16x128xf32> to vector<1x128xf32>
    %33 = vector.extract_strided_slice %21 {offsets = [2, 0], sizes = [1, 128], strides = [1, 1]} : vector<16x128xf32> to vector<1x128xf32>
    %34 = vector.extract_strided_slice %21 {offsets = [3, 0], sizes = [1, 128], strides = [1, 1]} : vector<16x128xf32> to vector<1x128xf32>
    %35 = vector.extract_strided_slice %21 {offsets = [4, 0], sizes = [1, 128], strides = [1, 1]} : vector<16x128xf32> to vector<1x128xf32>
    %36 = vector.extract_strided_slice %21 {offsets = [5, 0], sizes = [1, 128], strides = [1, 1]} : vector<16x128xf32> to vector<1x128xf32>
    %37 = vector.extract_strided_slice %21 {offsets = [6, 0], sizes = [1, 128], strides = [1, 1]} : vector<16x128xf32> to vector<1x128xf32>
    %38 = vector.extract_strided_slice %21 {offsets = [7, 0], sizes = [1, 128], strides = [1, 1]} : vector<16x128xf32> to vector<1x128xf32>
    %39 = vector.extract_strided_slice %21 {offsets = [8, 0], sizes = [1, 128], strides = [1, 1]} : vector<16x128xf32> to vector<1x128xf32>
    %40 = vector.extract_strided_slice %21 {offsets = [9, 0], sizes = [1, 128], strides = [1, 1]} : vector<16x128xf32> to vector<1x128xf32>
    %41 = vector.extract_strided_slice %21 {offsets = [10, 0], sizes = [1, 128], strides = [1, 1]} : vector<16x128xf32> to vector<1x128xf32>
    %42 = vector.extract_strided_slice %21 {offsets = [11, 0], sizes = [1, 128], strides = [1, 1]} : vector<16x128xf32> to vector<1x128xf32>
    %43 = vector.extract_strided_slice %21 {offsets = [12, 0], sizes = [1, 128], strides = [1, 1]} : vector<16x128xf32> to vector<1x128xf32>
    %44 = vector.extract_strided_slice %21 {offsets = [13, 0], sizes = [1, 128], strides = [1, 1]} : vector<16x128xf32> to vector<1x128xf32>
    %45 = vector.extract_strided_slice %21 {offsets = [14, 0], sizes = [1, 128], strides = [1, 1]} : vector<16x128xf32> to vector<1x128xf32>
    %46 = vector.extract_strided_slice %21 {offsets = [15, 0], sizes = [1, 128], strides = [1, 1]} : vector<16x128xf32> to vector<1x128xf32>
    %47 = arith.maximumf %31, %32 : vector<1x128xf32>
    %48 = arith.maximumf %33, %34 : vector<1x128xf32>
    %49 = arith.maximumf %35, %36 : vector<1x128xf32>
    %50 = arith.maximumf %37, %38 : vector<1x128xf32>
    %51 = arith.maximumf %39, %40 : vector<1x128xf32>
    %52 = arith.maximumf %41, %42 : vector<1x128xf32>
    %53 = arith.maximumf %43, %44 : vector<1x128xf32>
    %54 = arith.maximumf %45, %46 : vector<1x128xf32>
    %55 = tpu.concatenate %47, %49, %51, %53 in 0 : vector<1x128xf32>, vector<1x128xf32>, vector<1x128xf32>, vector<1x128xf32> -> vector<4x128xf32>
    %56 = tpu.concatenate %48, %50, %52, %54 in 0 : vector<1x128xf32>, vector<1x128xf32>, vector<1x128xf32>, vector<1x128xf32> -> vector<4x128xf32>
    %57 = vector.extract_strided_slice %55 {offsets = [0, 0], sizes = [4, 8], strides = [1, 1]} : vector<4x128xf32> to vector<4x8xf32>
    %58 = vector.extract_strided_slice %55 {offsets = [0, 16], sizes = [4, 8], strides = [1, 1]} : vector<4x128xf32> to vector<4x8xf32>
    %59 = vector.extract_strided_slice %55 {offsets = [0, 32], sizes = [4, 8], strides = [1, 1]} : vector<4x128xf32> to vector<4x8xf32>
    %60 = vector.extract_strided_slice %55 {offsets = [0, 48], sizes = [4, 8], strides = [1, 1]} : vector<4x128xf32> to vector<4x8xf32>
    %61 = vector.extract_strided_slice %55 {offsets = [0, 64], sizes = [4, 8], strides = [1, 1]} : vector<4x128xf32> to vector<4x8xf32>
    %62 = vector.extract_strided_slice %55 {offsets = [0, 80], sizes = [4, 8], strides = [1, 1]} : vector<4x128xf32> to vector<4x8xf32>
    %63 = vector.extract_strided_slice %55 {offsets = [0, 96], sizes = [4, 8], strides = [1, 1]} : vector<4x128xf32> to vector<4x8xf32>
    %64 = vector.extract_strided_slice %55 {offsets = [0, 112], sizes = [4, 8], strides = [1, 1]} : vector<4x128xf32> to vector<4x8xf32>
    %65 = tpu.concatenate %57, %58, %59, %60, %61, %62, %63, %64 in 1 : vector<4x8xf32>, vector<4x8xf32>, vector<4x8xf32>, vector<4x8xf32>, vector<4x8xf32>, vector<4x8xf32>, vector<4x8xf32>, vector<4x8xf32> -> vector<4x64xf32>
    %66 = vector.extract_strided_slice %55 {offsets = [0, 8], sizes = [4, 8], strides = [1, 1]} : vector<4x128xf32> to vector<4x8xf32>
    %67 = vector.extract_strided_slice %55 {offsets = [0, 24], sizes = [4, 8], strides = [1, 1]} : vector<4x128xf32> to vector<4x8xf32>
    %68 = vector.extract_strided_slice %55 {offsets = [0, 40], sizes = [4, 8], strides = [1, 1]} : vector<4x128xf32> to vector<4x8xf32>
    %69 = vector.extract_strided_slice %55 {offsets = [0, 56], sizes = [4, 8], strides = [1, 1]} : vector<4x128xf32> to vector<4x8xf32>
    %70 = vector.extract_strided_slice %55 {offsets = [0, 72], sizes = [4, 8], strides = [1, 1]} : vector<4x128xf32> to vector<4x8xf32>
    %71 = vector.extract_strided_slice %55 {offsets = [0, 88], sizes = [4, 8], strides = [1, 1]} : vector<4x128xf32> to vector<4x8xf32>
    %72 = vector.extract_strided_slice %55 {offsets = [0, 104], sizes = [4, 8], strides = [1, 1]} : vector<4x128xf32> to vector<4x8xf32>
    %73 = vector.extract_strided_slice %55 {offsets = [0, 120], sizes = [4, 8], strides = [1, 1]} : vector<4x128xf32> to vector<4x8xf32>
    %74 = tpu.concatenate %66, %67, %68, %69, %70, %71, %72, %73 in 1 : vector<4x8xf32>, vector<4x8xf32>, vector<4x8xf32>, vector<4x8xf32>, vector<4x8xf32>, vector<4x8xf32>, vector<4x8xf32>, vector<4x8xf32> -> vector<4x64xf32>
    %75 = arith.maximumf %65, %74 : vector<4x64xf32>
    %76 = vector.extract_strided_slice %56 {offsets = [0, 0], sizes = [4, 8], strides = [1, 1]} : vector<4x128xf32> to vector<4x8xf32>
    %77 = vector.extract_strided_slice %56 {offsets = [0, 16], sizes = [4, 8], strides = [1, 1]} : vector<4x128xf32> to vector<4x8xf32>
    %78 = vector.extract_strided_slice %56 {offsets = [0, 32], sizes = [4, 8], strides = [1, 1]} : vector<4x128xf32> to vector<4x8xf32>
    %79 = vector.extract_strided_slice %56 {offsets = [0, 48], sizes = [4, 8], strides = [1, 1]} : vector<4x128xf32> to vector<4x8xf32>
    %80 = vector.extract_strided_slice %56 {offsets = [0, 64], sizes = [4, 8], strides = [1, 1]} : vector<4x128xf32> to vector<4x8xf32>
    %81 = vector.extract_strided_slice %56 {offsets = [0, 80], sizes = [4, 8], strides = [1, 1]} : vector<4x128xf32> to vector<4x8xf32>
    %82 = vector.extract_strided_slice %56 {offsets = [0, 96], sizes = [4, 8], strides = [1, 1]} : vector<4x128xf32> to vector<4x8xf32>
    %83 = vector.extract_strided_slice %56 {offsets = [0, 112], sizes = [4, 8], strides = [1, 1]} : vector<4x128xf32> to vector<4x8xf32>
    %84 = tpu.concatenate %76, %77, %78, %79, %80, %81, %82, %83 in 1 : vector<4x8xf32>, vector<4x8xf32>, vector<4x8xf32>, vector<4x8xf32>, vector<4x8xf32>, vector<4x8xf32>, vector<4x8xf32>, vector<4x8xf32> -> vector<4x64xf32>
    %85 = vector.extract_strided_slice %56 {offsets = [0, 8], sizes = [4, 8], strides = [1, 1]} : vector<4x128xf32> to vector<4x8xf32>
    %86 = vector.extract_strided_slice %56 {offsets = [0, 24], sizes = [4, 8], strides = [1, 1]} : vector<4x128xf32> to vector<4x8xf32>
    %87 = vector.extract_strided_slice %56 {offsets = [0, 40], sizes = [4, 8], strides = [1, 1]} : vector<4x128xf32> to vector<4x8xf32>
    %88 = vector.extract_strided_slice %56 {offsets = [0, 56], sizes = [4, 8], strides = [1, 1]} : vector<4x128xf32> to vector<4x8xf32>
    %89 = vector.extract_strided_slice %56 {offsets = [0, 72], sizes = [4, 8], strides = [1, 1]} : vector<4x128xf32> to vector<4x8xf32>
    %90 = vector.extract_strided_slice %56 {offsets = [0, 88], sizes = [4, 8], strides = [1, 1]} : vector<4x128xf32> to vector<4x8xf32>
    %91 = vector.extract_strided_slice %56 {offsets = [0, 104], sizes = [4, 8], strides = [1, 1]} : vector<4x128xf32> to vector<4x8xf32>
    %92 = vector.extract_strided_slice %56 {offsets = [0, 120], sizes = [4, 8], strides = [1, 1]} : vector<4x128xf32> to vector<4x8xf32>
    %93 = tpu.concatenate %85, %86, %87, %88, %89, %90, %91, %92 in 1 : vector<4x8xf32>, vector<4x8xf32>, vector<4x8xf32>, vector<4x8xf32>, vector<4x8xf32>, vector<4x8xf32>, vector<4x8xf32>, vector<4x8xf32> -> vector<4x64xf32>
    %94 = arith.maximumf %84, %93 : vector<4x64xf32>
    %95 = tpu.concatenate %75, %94 in 1 : vector<4x64xf32>, vector<4x64xf32> -> vector<4x128xf32>
    %c0_21 = arith.constant 0 : index
    %c0_22 = arith.constant 0 : index
    %c0_23 = arith.constant 0 : index
    %96 = vector.load %arg11[%c0_21, %c0_22, %c0_23] : memref<1x4x128xf32, #tpu.memory_space<vmem>>, vector<1x4x128xf32>
    %97 = vector.shape_cast %96 : vector<1x4x128xf32> to vector<4x128xf32>
    %98 = vector.shape_cast %95 : vector<4x128xf32> to vector<1x4x128xf32>
    tpu.vector_store %arg11[%c0_21, %c0_22, %c0_23], %98 {strides = array<i32>} : memref<1x4x128xf32, #tpu.memory_space<vmem>>, vector<1x4x128xf32>,
    %cst_24 = arith.constant 0.000000e+00 : f32
    %99 = vector.broadcast %cst_24 : f32 to vector<1x64xf32>
    %100 = vector.extract_strided_slice %94 {offsets = [0, 0], sizes = [3, 64], strides = [1, 1]} : vector<4x64xf32> to vector<3x64xf32>
    %101 = tpu.concatenate %99, %100 in 0 : vector<1x64xf32>, vector<3x64xf32> -> vector<4x64xf32>
    %102 = vector.extract_strided_slice %75 {offsets = [1, 0], sizes = [3, 64], strides = [1, 1]} : vector<4x64xf32> to vector<3x64xf32>
    %103 = tpu.concatenate %102, %99 in 0 : vector<3x64xf32>, vector<1x64xf32> -> vector<4x64xf32>
    %104 = tpu.concatenate %101, %75, %94, %103 in 1 : vector<4x64xf32>, vector<4x64xf32>, vector<4x64xf32>, vector<4x64xf32> -> vector<4x256xf32>
    %105 = arith.truncf %104 : vector<4x256xf32> to vector<4x256xbf16>
    %c0_25 = arith.constant 0 : index
    %c0_26 = arith.constant 0 : index
    %c0_27 = arith.constant 0 : index
    %106 = vector.load %arg6[%c0_25, %c0_26, %c0_27] : memref<4x256x128xbf16, #tpu.memory_space<vmem>>, vector<1x256x128xbf16>
    %107 = vector.shape_cast %106 : vector<1x256x128xbf16> to vector<256x128xbf16>
    %cst_28 = arith.constant dense<0.000000e+00> : vector<4x128xf32>
    %108 = tpu.matmul %105, %107, %cst_28 {dimension_numbers = #tpu.dot_dimension_numbers<[1], [0], [0], [1], [0, 0, 1, 1], [], []>} : vector<4x256xbf16>, vector<256x128xbf16>, vector<4x128xf32> -> vector<4x128xf32>
    %c0_29 = arith.constant 0 : index
    %c0_30 = arith.constant 0 : index
    %c0_31 = arith.constant 0 : index
    %109 = vector.load %arg7[%c0_29, %c0_30, %c0_31] : memref<4x1x128xf32, #tpu.memory_space<vmem>>, vector<1x1x128xf32>
    %110 = vector.shape_cast %109 : vector<1x1x128xf32> to vector<1x128xf32>
    %111 = vector.broadcast %110 : vector<1x128xf32> to vector<4x128xf32>
    %112 = arith.addf %108, %111 : vector<4x128xf32>
    %cst_32 = arith.constant 0.000000e+00 : f32
    %113 = vector.broadcast %cst_32 : f32 to vector<4x128xf32>
    %114 = arith.maximumf %112, %113 : vector<4x128xf32>
    %c0_33 = arith.constant 0 : index
    %c0_34 = arith.constant 0 : index
    %c0_35 = arith.constant 0 : index
    %115 = vector.load %arg12[%c0_33, %c0_34, %c0_35] : memref<1x4x128xf32, #tpu.memory_space<vmem>>, vector<1x4x128xf32>
    %116 = vector.shape_cast %115 : vector<1x4x128xf32> to vector<4x128xf32>
    %117 = vector.shape_cast %114 : vector<4x128xf32> to vector<1x4x128xf32>
    tpu.vector_store %arg12[%c0_33, %c0_34, %c0_35], %117 {strides = array<i32>} : memref<1x4x128xf32, #tpu.memory_space<vmem>>, vector<1x4x128xf32>,
    %118 = vector.extract_strided_slice %114 {offsets = [0, 0], sizes = [4, 64], strides = [1, 1]} : vector<4x128xf32> to vector<4x64xf32>
    %119 = vector.extract_strided_slice %114 {offsets = [0, 64], sizes = [4, 64], strides = [1, 1]} : vector<4x128xf32> to vector<4x64xf32>
    %120 = vector.extract_strided_slice %119 {offsets = [0, 0], sizes = [3, 64], strides = [1, 1]} : vector<4x64xf32> to vector<3x64xf32>
    %121 = tpu.concatenate %99, %120 in 0 : vector<1x64xf32>, vector<3x64xf32> -> vector<4x64xf32>
    %122 = vector.extract_strided_slice %118 {offsets = [1, 0], sizes = [3, 64], strides = [1, 1]} : vector<4x64xf32> to vector<3x64xf32>
    %123 = tpu.concatenate %122, %99 in 0 : vector<3x64xf32>, vector<1x64xf32> -> vector<4x64xf32>
    %124 = tpu.concatenate %121, %118, %119, %123 in 1 : vector<4x64xf32>, vector<4x64xf32>, vector<4x64xf32>, vector<4x64xf32> -> vector<4x256xf32>
    %125 = arith.truncf %124 : vector<4x256xf32> to vector<4x256xbf16>
    %c1 = arith.constant 1 : index
    %c0_36 = arith.constant 0 : index
    %c0_37 = arith.constant 0 : index
    %126 = vector.load %arg6[%c1, %c0_36, %c0_37] : memref<4x256x128xbf16, #tpu.memory_space<vmem>>, vector<1x256x128xbf16>
    %127 = vector.shape_cast %126 : vector<1x256x128xbf16> to vector<256x128xbf16>
    %cst_38 = arith.constant dense<0.000000e+00> : vector<4x128xf32>
    %128 = tpu.matmul %125, %127, %cst_38 {dimension_numbers = #tpu.dot_dimension_numbers<[1], [0], [0], [1], [0, 0, 1, 1], [], []>} : vector<4x256xbf16>, vector<256x128xbf16>, vector<4x128xf32> -> vector<4x128xf32>
    %c1_39 = arith.constant 1 : index
    %c0_40 = arith.constant 0 : index
    %c0_41 = arith.constant 0 : index
    %129 = vector.load %arg7[%c1_39, %c0_40, %c0_41] : memref<4x1x128xf32, #tpu.memory_space<vmem>>, vector<1x1x128xf32>
    %130 = vector.shape_cast %129 : vector<1x1x128xf32> to vector<1x128xf32>
    %131 = vector.broadcast %130 : vector<1x128xf32> to vector<4x128xf32>
    %132 = arith.addf %128, %131 : vector<4x128xf32>
    %cst_42 = arith.constant 0.000000e+00 : f32
    %133 = vector.broadcast %cst_42 : f32 to vector<4x128xf32>
    %134 = arith.maximumf %132, %133 : vector<4x128xf32>
    %c0_43 = arith.constant 0 : index
    %c0_44 = arith.constant 0 : index
    %c0_45 = arith.constant 0 : index
    %135 = vector.load %arg13[%c0_43, %c0_44, %c0_45] : memref<1x4x128xf32, #tpu.memory_space<vmem>>, vector<1x4x128xf32>
    %136 = vector.shape_cast %135 : vector<1x4x128xf32> to vector<4x128xf32>
    %137 = vector.shape_cast %134 : vector<4x128xf32> to vector<1x4x128xf32>
    tpu.vector_store %arg13[%c0_43, %c0_44, %c0_45], %137 {strides = array<i32>} : memref<1x4x128xf32, #tpu.memory_space<vmem>>, vector<1x4x128xf32>,
    %138 = vector.extract_strided_slice %134 {offsets = [0, 0], sizes = [4, 64], strides = [1, 1]} : vector<4x128xf32> to vector<4x64xf32>
    %139 = vector.extract_strided_slice %134 {offsets = [0, 64], sizes = [4, 64], strides = [1, 1]} : vector<4x128xf32> to vector<4x64xf32>
    %140 = vector.extract_strided_slice %139 {offsets = [0, 0], sizes = [3, 64], strides = [1, 1]} : vector<4x64xf32> to vector<3x64xf32>
    %141 = tpu.concatenate %99, %140 in 0 : vector<1x64xf32>, vector<3x64xf32> -> vector<4x64xf32>
    %142 = vector.extract_strided_slice %138 {offsets = [1, 0], sizes = [3, 64], strides = [1, 1]} : vector<4x64xf32> to vector<3x64xf32>
    %143 = tpu.concatenate %142, %99 in 0 : vector<3x64xf32>, vector<1x64xf32> -> vector<4x64xf32>
    %144 = tpu.concatenate %141, %138, %139, %143 in 1 : vector<4x64xf32>, vector<4x64xf32>, vector<4x64xf32>, vector<4x64xf32> -> vector<4x256xf32>
    %145 = arith.truncf %144 : vector<4x256xf32> to vector<4x256xbf16>
    %c2 = arith.constant 2 : index
    %c0_46 = arith.constant 0 : index
    %c0_47 = arith.constant 0 : index
    %146 = vector.load %arg6[%c2, %c0_46, %c0_47] : memref<4x256x128xbf16, #tpu.memory_space<vmem>>, vector<1x256x128xbf16>
    %147 = vector.shape_cast %146 : vector<1x256x128xbf16> to vector<256x128xbf16>
    %cst_48 = arith.constant dense<0.000000e+00> : vector<4x128xf32>
    %148 = tpu.matmul %145, %147, %cst_48 {dimension_numbers = #tpu.dot_dimension_numbers<[1], [0], [0], [1], [0, 0, 1, 1], [], []>} : vector<4x256xbf16>, vector<256x128xbf16>, vector<4x128xf32> -> vector<4x128xf32>
    %c2_49 = arith.constant 2 : index
    %c0_50 = arith.constant 0 : index
    %c0_51 = arith.constant 0 : index
    %149 = vector.load %arg7[%c2_49, %c0_50, %c0_51] : memref<4x1x128xf32, #tpu.memory_space<vmem>>, vector<1x1x128xf32>
    %150 = vector.shape_cast %149 : vector<1x1x128xf32> to vector<1x128xf32>
    %151 = vector.broadcast %150 : vector<1x128xf32> to vector<4x128xf32>
    %152 = arith.addf %148, %151 : vector<4x128xf32>
    %cst_52 = arith.constant 0.000000e+00 : f32
    %153 = vector.broadcast %cst_52 : f32 to vector<4x128xf32>
    %154 = arith.maximumf %152, %153 : vector<4x128xf32>
    %c0_53 = arith.constant 0 : index
    %c0_54 = arith.constant 0 : index
    %c0_55 = arith.constant 0 : index
    %155 = vector.load %arg14[%c0_53, %c0_54, %c0_55] : memref<1x4x128xf32, #tpu.memory_space<vmem>>, vector<1x4x128xf32>
    %156 = vector.shape_cast %155 : vector<1x4x128xf32> to vector<4x128xf32>
    %157 = vector.shape_cast %154 : vector<4x128xf32> to vector<1x4x128xf32>
    tpu.vector_store %arg14[%c0_53, %c0_54, %c0_55], %157 {strides = array<i32>} : memref<1x4x128xf32, #tpu.memory_space<vmem>>, vector<1x4x128xf32>,
    %158 = vector.extract_strided_slice %154 {offsets = [0, 0], sizes = [4, 64], strides = [1, 1]} : vector<4x128xf32> to vector<4x64xf32>
    %159 = vector.extract_strided_slice %154 {offsets = [0, 64], sizes = [4, 64], strides = [1, 1]} : vector<4x128xf32> to vector<4x64xf32>
    %160 = vector.extract_strided_slice %159 {offsets = [0, 0], sizes = [3, 64], strides = [1, 1]} : vector<4x64xf32> to vector<3x64xf32>
    %161 = tpu.concatenate %99, %160 in 0 : vector<1x64xf32>, vector<3x64xf32> -> vector<4x64xf32>
    %162 = vector.extract_strided_slice %158 {offsets = [1, 0], sizes = [3, 64], strides = [1, 1]} : vector<4x64xf32> to vector<3x64xf32>
    %163 = tpu.concatenate %162, %99 in 0 : vector<3x64xf32>, vector<1x64xf32> -> vector<4x64xf32>
    %164 = tpu.concatenate %161, %158, %159, %163 in 1 : vector<4x64xf32>, vector<4x64xf32>, vector<4x64xf32>, vector<4x64xf32> -> vector<4x256xf32>
    %165 = arith.truncf %164 : vector<4x256xf32> to vector<4x256xbf16>
    %c3 = arith.constant 3 : index
    %c0_56 = arith.constant 0 : index
    %c0_57 = arith.constant 0 : index
    %166 = vector.load %arg6[%c3, %c0_56, %c0_57] : memref<4x256x128xbf16, #tpu.memory_space<vmem>>, vector<1x256x128xbf16>
    %167 = vector.shape_cast %166 : vector<1x256x128xbf16> to vector<256x128xbf16>
    %cst_58 = arith.constant dense<0.000000e+00> : vector<4x128xf32>
    %168 = tpu.matmul %165, %167, %cst_58 {dimension_numbers = #tpu.dot_dimension_numbers<[1], [0], [0], [1], [0, 0, 1, 1], [], []>} : vector<4x256xbf16>, vector<256x128xbf16>, vector<4x128xf32> -> vector<4x128xf32>
    %c3_59 = arith.constant 3 : index
    %c0_60 = arith.constant 0 : index
    %c0_61 = arith.constant 0 : index
    %169 = vector.load %arg7[%c3_59, %c0_60, %c0_61] : memref<4x1x128xf32, #tpu.memory_space<vmem>>, vector<1x1x128xf32>
    %170 = vector.shape_cast %169 : vector<1x1x128xf32> to vector<1x128xf32>
    %171 = vector.broadcast %170 : vector<1x128xf32> to vector<4x128xf32>
    %172 = arith.addf %168, %171 : vector<4x128xf32>
    %cst_62 = arith.constant 0.000000e+00 : f32
    %173 = vector.broadcast %cst_62 : f32 to vector<4x128xf32>
    %174 = arith.maximumf %172, %173 : vector<4x128xf32>
    %c0_63 = arith.constant 0 : index
    %c0_64 = arith.constant 0 : index
    %c0_65 = arith.constant 0 : index
    %175 = vector.load %arg15[%c0_63, %c0_64, %c0_65] : memref<1x4x128xf32, #tpu.memory_space<vmem>>, vector<1x4x128xf32>
    %176 = vector.shape_cast %175 : vector<1x4x128xf32> to vector<4x128xf32>
    %177 = vector.shape_cast %174 : vector<4x128xf32> to vector<1x4x128xf32>
    tpu.vector_store %arg15[%c0_63, %c0_64, %c0_65], %177 {strides = array<i32>} : memref<1x4x128xf32, #tpu.memory_space<vmem>>, vector<1x4x128xf32>,
    %cst_66 = arith.constant dense<0.000000e+00> : vector<128xf32>
    %178 = vector.multi_reduction <add>, %174, %cst_66 [0] : vector<4x128xf32> to vector<128xf32>
    %179 = vector.shape_cast %178 : vector<128xf32> to vector<1x128xf32>
    %180 = vector.extract_strided_slice %179 {offsets = [0, 0], sizes = [1, 8], strides = [1, 1]} : vector<1x128xf32> to vector<1x8xf32>
    %181 = vector.extract_strided_slice %179 {offsets = [0, 8], sizes = [1, 8], strides = [1, 1]} : vector<1x128xf32> to vector<1x8xf32>
    %182 = arith.addf %180, %181 : vector<1x8xf32>
    %183 = vector.extract_strided_slice %179 {offsets = [0, 16], sizes = [1, 8], strides = [1, 1]} : vector<1x128xf32> to vector<1x8xf32>
    %184 = arith.addf %182, %183 : vector<1x8xf32>
    %185 = vector.extract_strided_slice %179 {offsets = [0, 24], sizes = [1, 8], strides = [1, 1]} : vector<1x128xf32> to vector<1x8xf32>
    %186 = arith.addf %184, %185 : vector<1x8xf32>
    %187 = vector.extract_strided_slice %179 {offsets = [0, 32], sizes = [1, 8], strides = [1, 1]} : vector<1x128xf32> to vector<1x8xf32>
    %188 = arith.addf %186, %187 : vector<1x8xf32>
    %189 = vector.extract_strided_slice %179 {offsets = [0, 40], sizes = [1, 8], strides = [1, 1]} : vector<1x128xf32> to vector<1x8xf32>
    %190 = arith.addf %188, %189 : vector<1x8xf32>
    %191 = vector.extract_strided_slice %179 {offsets = [0, 48], sizes = [1, 8], strides = [1, 1]} : vector<1x128xf32> to vector<1x8xf32>
    %192 = arith.addf %190, %191 : vector<1x8xf32>
    %193 = vector.extract_strided_slice %179 {offsets = [0, 56], sizes = [1, 8], strides = [1, 1]} : vector<1x128xf32> to vector<1x8xf32>
    %194 = arith.addf %192, %193 : vector<1x8xf32>
    %195 = vector.extract_strided_slice %179 {offsets = [0, 64], sizes = [1, 8], strides = [1, 1]} : vector<1x128xf32> to vector<1x8xf32>
    %196 = arith.addf %194, %195 : vector<1x8xf32>
    %197 = vector.extract_strided_slice %179 {offsets = [0, 72], sizes = [1, 8], strides = [1, 1]} : vector<1x128xf32> to vector<1x8xf32>
    %198 = arith.addf %196, %197 : vector<1x8xf32>
    %199 = vector.extract_strided_slice %179 {offsets = [0, 80], sizes = [1, 8], strides = [1, 1]} : vector<1x128xf32> to vector<1x8xf32>
    %200 = arith.addf %198, %199 : vector<1x8xf32>
    %201 = vector.extract_strided_slice %179 {offsets = [0, 88], sizes = [1, 8], strides = [1, 1]} : vector<1x128xf32> to vector<1x8xf32>
    %202 = arith.addf %200, %201 : vector<1x8xf32>
    %203 = vector.extract_strided_slice %179 {offsets = [0, 96], sizes = [1, 8], strides = [1, 1]} : vector<1x128xf32> to vector<1x8xf32>
    %204 = arith.addf %202, %203 : vector<1x8xf32>
    %205 = vector.extract_strided_slice %179 {offsets = [0, 104], sizes = [1, 8], strides = [1, 1]} : vector<1x128xf32> to vector<1x8xf32>
    %206 = arith.addf %204, %205 : vector<1x8xf32>
    %207 = vector.extract_strided_slice %179 {offsets = [0, 112], sizes = [1, 8], strides = [1, 1]} : vector<1x128xf32> to vector<1x8xf32>
    %208 = arith.addf %206, %207 : vector<1x8xf32>
    %209 = vector.extract_strided_slice %179 {offsets = [0, 120], sizes = [1, 8], strides = [1, 1]} : vector<1x128xf32> to vector<1x8xf32>
    %210 = arith.addf %208, %209 : vector<1x8xf32>
    %cst_67 = arith.constant 1.562500e-02 : f32
    %211 = vector.broadcast %cst_67 : f32 to vector<1x8xf32>
    %212 = arith.mulf %210, %211 : vector<1x8xf32>
    %c0_68 = arith.constant 0 : index
    %c0_69 = arith.constant 0 : index
    %c0_70 = arith.constant 0 : index
    %213 = vector.load %arg16[%c0_68, %c0_69, %c0_70] : memref<1x1x8xf32, #tpu.memory_space<vmem>>, vector<1x1x8xf32>
    %214 = vector.shape_cast %213 : vector<1x1x8xf32> to vector<1x8xf32>
    %215 = vector.shape_cast %212 : vector<1x8xf32> to vector<1x1x8xf32>
    tpu.vector_store %arg16[%c0_68, %c0_69, %c0_70], %215 {strides = array<i32>} : memref<1x1x8xf32, #tpu.memory_space<vmem>>, vector<1x1x8xf32>,
    return
  }
  func.func @transform_0(%arg0: i32) -> (i32, i32, i32) {
    %c0_i32 = arith.constant 0 : i32
    %c0_i32_0 = arith.constant 0 : i32
    %c0_i32_1 = arith.constant 0 : i32
    return %arg0, %c0_i32, %c0_i32_0 : i32, i32, i32
  }
  func.func @transform_1(%arg0: i32) -> (i32, i32) {
    %c0_i32 = arith.constant 0 : i32
    %c0_i32_0 = arith.constant 0 : i32
    %c0_i32_1 = arith.constant 0 : i32
    return %c0_i32, %c0_i32_0 : i32, i32
  }
  func.func @transform_2(%arg0: i32) -> (i32, i32) {
    %c0_i32 = arith.constant 0 : i32
    %c0_i32_0 = arith.constant 0 : i32
    %c0_i32_1 = arith.constant 0 : i32
    return %c0_i32, %c0_i32_0 : i32, i32
  }
  func.func @transform_3(%arg0: i32) -> (i32, i32) {
    %c0_i32 = arith.constant 0 : i32
    %c0_i32_0 = arith.constant 0 : i32
    %c0_i32_1 = arith.constant 0 : i32
    return %c0_i32, %c0_i32_0 : i32, i32
  }
  func.func @transform_4(%arg0: i32) -> (i32, i32) {
    %c0_i32 = arith.constant 0 : i32
    %c0_i32_0 = arith.constant 0 : i32
    %c0_i32_1 = arith.constant 0 : i32
    return %c0_i32, %c0_i32_0 : i32, i32
  }
  func.func @transform_5(%arg0: i32) -> (i32, i32, i32) {
    %c0_i32 = arith.constant 0 : i32
    %c0_i32_0 = arith.constant 0 : i32
    %c0_i32_1 = arith.constant 0 : i32
    %c0_i32_2 = arith.constant 0 : i32
    return %c0_i32, %c0_i32_0, %c0_i32_1 : i32, i32, i32
  }
  func.func @transform_6(%arg0: i32) -> (i32, i32, i32) {
    %c0_i32 = arith.constant 0 : i32
    %c0_i32_0 = arith.constant 0 : i32
    %c0_i32_1 = arith.constant 0 : i32
    %c0_i32_2 = arith.constant 0 : i32
    return %c0_i32, %c0_i32_0, %c0_i32_1 : i32, i32, i32
  }
  func.func @transform_7(%arg0: i32) -> (i32, i32, i32) {
    %c0_i32 = arith.constant 0 : i32
    %c0_i32_0 = arith.constant 0 : i32
    %c0_i32_1 = arith.constant 0 : i32
    return %arg0, %c0_i32, %c0_i32_0 : i32, i32, i32
  }
  func.func @transform_8(%arg0: i32) -> (i32, i32, i32) {
    %c0_i32 = arith.constant 0 : i32
    %c0_i32_0 = arith.constant 0 : i32
    %c0_i32_1 = arith.constant 0 : i32
    return %arg0, %c0_i32, %c0_i32_0 : i32, i32, i32
  }
  func.func @transform_9(%arg0: i32) -> (i32, i32, i32) {
    %c0_i32 = arith.constant 0 : i32
    %c0_i32_0 = arith.constant 0 : i32
    %c0_i32_1 = arith.constant 0 : i32
    return %arg0, %c0_i32, %c0_i32_0 : i32, i32, i32
  }
  func.func @transform_10(%arg0: i32) -> (i32, i32, i32) {
    %c0_i32 = arith.constant 0 : i32
    %c0_i32_0 = arith.constant 0 : i32
    %c0_i32_1 = arith.constant 0 : i32
    return %arg0, %c0_i32, %c0_i32_0 : i32, i32, i32
  }
  func.func @transform_11(%arg0: i32) -> (i32, i32, i32) {
    %c0_i32 = arith.constant 0 : i32
    %c0_i32_0 = arith.constant 0 : i32
    %c0_i32_1 = arith.constant 0 : i32
    return %arg0, %c0_i32, %c0_i32_0 : i32, i32, i32
  }
  func.func @transform_12(%arg0: i32) -> (i32, i32, i32) {
    %c0_i32 = arith.constant 0 : i32
    %c0_i32_0 = arith.constant 0 : i32
    %c0_i32_1 = arith.constant 0 : i32
    return %arg0, %c0_i32, %c0_i32_0 : i32, i32, i32
  }
  func.func @transform_13(%arg0: i32) -> (i32, i32, i32) {
    %c0_i32 = arith.constant 0 : i32
    %c0_i32_0 = arith.constant 0 : i32
    %c0_i32_1 = arith.constant 0 : i32
    return %arg0, %c0_i32, %c0_i32_0 : i32, i32, i32
  }
  func.func @transform_14(%arg0: i32) -> (i32, i32, i32) {
    %c0_i32 = arith.constant 0 : i32
    %c0_i32_0 = arith.constant 0 : i32
    %c0_i32_1 = arith.constant 0 : i32
    return %arg0, %c0_i32, %c0_i32_0 : i32, i32, i32
  }
  func.func @transform_15(%arg0: i32) -> (i32, i32, i32) {
    %c0_i32 = arith.constant 0 : i32
    %c0_i32_0 = arith.constant 0 : i32
    %c0_i32_1 = arith.constant 0 : i32
    return %arg0, %c0_i32, %c0_i32_0 : i32, i32, i32
  }
}

</mosaic_0001>

<bundles_post_ra>
// kernel: forward.1
= control target key start
LH: loop header
LB: loop body
LE: loop exit
PB: predicated region body
PF: predicated region fallthrough
CT: control target
= control target key end

     0   :  { %s2993_s0 = inlined_call_operand.vmem [shape: f32[2,16,64], index: 0, kind: input, shape index: {}]   ;;  %s2994_s1 = inlined_call_operand.vmem [shape: bf16[192,128], index: 1, kind: input, shape index: {}]   ;;  %s2995_s2 = inlined_call_operand.vmem [shape: f32[1,128], index: 2, kind: input, shape index: {}]   ;;  %s2996_s3 = inlined_call_operand.vmem [shape: f32[1,128], index: 3, kind: input, shape index: {}]   ;;  %s2997_s4 = inlined_call_operand.vmem [shape: f32[1,128], index: 4, kind: input, shape index: {}]   ;;  %s2998_s5 = inlined_call_operand.hbm [shape: bf16[4,256,128], index: 5, kind: input, shape index: {}]   ;;  %s2999_s6 = inlined_call_operand.vmem [shape: f32[4,1,128], index: 6, kind: input, shape index: {}]   ;;  %s3000_s7 = inlined_call_operand.vmem [shape: f32[2,16,128], index: 7, kind: output, shape index: {0}]   ;;  %s3001_s8 = inlined_call_operand.vmem [shape: f32[2,16,128], index: 8, kind: output, shape index: {1}]   ;;  %s3002_s9 = inlined_call_operand.vmem [shape: f32[2,16,128], index: 9, kind: output, shape index: {2}]   ;;  %s3003_s10 = inlined_call_operand.vmem [shape: f32[2,4,128], index: 10, kind: output, shape index: {3}]   ;;  %s3004_s11 = inlined_call_operand.vmem [shape: f32[2,4,128], index: 11, kind: output, shape index: {4}]   ;;  %s3005_s12 = inlined_call_operand.vmem [shape: f32[2,4,128], index: 12, kind: output, shape index: {5}]   ;;  %s3006_s13 = inlined_call_operand.vmem [shape: f32[2,4,128], index: 13, kind: output, shape index: {6}]   ;;  %s3007_s14 = inlined_call_operand.vmem [shape: f32[2,4,128], index: 14, kind: output, shape index: {7}]   ;;  %s3008_s15 = inlined_call_operand.hbm [shape: f32[2,1,8], index: 15, kind: output, shape index: {8}]  }
   0x1   :  { %3017 = sst [smem:[#allocation11_spill]] %s2993_s0 }
   0x2   :  { %3018 = sst [smem:[#allocation12_spill]] %s2994_s1 }
   0x3   :  { %3019 = sst [smem:[#allocation13_spill]] %s2998_s5 }
   0x4   :  { %21 = vsyncpa [#allocation3], 0 }
   0x5   :  { %22 = vsyncpa [#allocation4], 0 }
   0x6   :  { %24 = vsyncpa [#allocation4 + $0x1], 0  ;;  %s2680_s18 = smov 0   ;;  %s2682_s19 = smov 0  }
   0x7   :  { %s2684_s20 = smov 0   ;;  %s2686_s21 = smov 0  }
   0x8 LB: > { %3020 = sst [smem:[#allocation8_spill]] %s2574_s20  ;;  %s2701_s22 = sadd.s32 4294967295, %s2578_s21   ;;  %s2578_s21 = sphi %s2686_s21, %s3034_s21   ;;  %s2574_s20 = sphi %s2684_s20, %s3036_s20   ;;  %s2570_s19 = sphi %s2682_s19, %s3038_s19   ;;  %s2566_s18 = sphi %s2680_s18, %s3037_s18  }
   0x9   : > { %s2118_s23 = sadd.s32 4294967294, %s2578_s21   ;;  %s2705_s24 = sadd.s32 1, %s2578_s21  }
   0xa   : > { %3021 = sst [smem:[#allocation9_spill]] %s2705_s24  ;;  %s397_s25 = sadd.s32 1, %s2574_s20 }
   0xb   : > { %s394_s26 = ssub.s32 %s2578_s21, %s2705_s24  ;;  %p407_p0 = scmp.ne.s32.totalorder %s2574_s20, %s2570_s19 }
   0xc   : > { %p395_p1 = scmp.eq.s32.totalorder %s394_s26, 0  ;;  %p408_p2 = scmp.eq.s32.totalorder %s2701_s22, 1 }
   0xd   : > { %p413_p3 = scmp.ne.s32.totalorder %s2570_s19, %s2566_s18  ;;  %p414_p4 = scmp.eq.s32.totalorder %s2118_s23, 1 }
   0xe   : > { %s2716_s27 = scalar_select %p395_p1, %s2574_s20, %s397_s25  }
   0xf   : > { %p2718_p5 = por %p408_p2, %p407_p0  ;;  %p2722_p6 = por %p414_p4, %p413_p3 }
  0x10   : > { %3022 = sst [smem:[#allocation10_spill]] %s2716_s27  ;;  %p2119_p7 = scmp.ge.s32.totalorder %s2578_s21, 1 }
  0x11   : > { %s3024_s29 = scalar_select %p2722_p6, 1, 0 }
  0x12   : > { %p421_p8 = scmp.lt.s32.totalorder %s2578_s21, 3  ;;  %p2333_p9 = scmp.eq.s32.totalorder %s2701_s22, 0 }
  0x13   : > { %s2580_s16 = smov [#allocation2]  }
  0x14   : > { %p2729_p10 = pnand %p2119_p7, %p421_p8  ;;  %s445_s17 = sshll.u32 %s2580_s16, 4  ;;  %s446_s17 = int_to_ptr.vmem [resolvable:$true] %s445_s17 }
  0x15   : > { %s2499_s23 = scalar_lea.vmem %s446_s17, 8192  ;;  %p2507_p3 = scmp.lt.s32.totalorder %s446_s17, %s446_s17 }
  0x16   : > { %p2325_p11 = pneg %p2729_p10  ;;  %p2500_p0 = scmp.ne.s32.totalorder %s446_s17, %s2499_s23 }
  0x17   : > { %p2508_p4 = scmp.lt.s32.totalorder %s2499_s23, %s2499_s23 }
  0x18   : > { %p2326_p12 = pnand %p2333_p9, %p2325_p11 }
  0x19   : > { %p2509_p6 = por %p2508_p4, %p2507_p3 }
  0x1a   : > { %p2490_p13 = pneg %p2326_p12 }
  0x1c   : > { %p2502_p1 = pnand %p2500_p0, %p2490_p13 }
  0x1e   : > { %p2503_p2 = pneg %p2502_p1 }
  0x20   : > { %p2510_p7 = pnand %p2509_p6, %p2503_p2 }
  0x22   : > { %2513 = shalt.err (!%p2510_p7)
}
  0x23   : > { %s2581_s25 = smov 64   ;;  %s2582_s26 = smov 4  }
  0x24   : > { %s3026_s5 = sld [smem:[#allocation13_spill]] }
  0x26   : > { %472 = sbr.rel (%p2729_p10) target bundleno = 1996 (0x7cc), region = 48 }
  0x2a   : > { %2328 = dma.hbm_to_vmem [thread:$0]  (!%p2326_p12), %s3026_s5, 8192, %s446_s17, [#allocation3], %s2581_s25, %s2581_s25, %s2582_s26  }
  0x2b   : > { %2557 = dma.done.wait (%p2333_p9), [#allocation3], 8192  }
  0x2c   : > { %2559 = vsyncadd (%p2333_p9), [#allocation3], 4294959104  ;;  %p554_p8 = scmp.lt.s32.totalorder %s2701_s22, 1  ;;  %v2583_v0 = vmov 0   ;;  %s3027_s0 = sld [smem:[#allocation11_spill]]  ;;  %vm606_vm0 = vcmask 1046528  }
  0x2d   : > { %730 = vmatprep.subr.bf16.mxu0 %v2583_v0  ;;  %vm599_vm1 = vcmask 1040384   ;;  %s3028_s1 = sld [smem:[#allocation12_spill]]  ;;  %s3010_s26 = smov 64   ;;  %vm619_vm2 = vcmask 523264   ;;  %v2137_v31 = vld [vmem:[%s2995_s2] ss:$0 sm:$0xff] }
  0x2e   : > { %s2748_s16 = scalar_select %p554_p8, %s2701_s22, 1  ;;  %v2151_v33 = vld [vmem:[%s2996_s3] ss:$0 sm:$0xff]  ;;  %vm816_vm3 = vcmask 1042432   ;;  %vm814_vm4 = vcmask 1041408   ;;  %v2424_v62 = vld [vmem:[#allocation2 + $0x78] sm:$0xff]  }
  0x2f   : > { %v2152_v35 = vld [vmem:[%s2997_s4] ss:$0 sm:$0xff]  ;;  %s2586_s24 = smov 120   ;;  %s3015_s17 = smov 88   ;;  %v2425_v63 = vld [vmem:[#allocation2 + $0x38] sm:$0xff]   ;;  %2231 = vmatprep.subr.bf16.mxu1 %v2424_v62  ;;  %vm849_vm5 = vcmask 64512  }
  0x30   : > { %s2751_s23 = sshll.u32 %s2748_s16, 4  ;;  %s3016_s25 = smov 80   ;;  %2232 = vmatpush3.bf16.msra.mxu1 %v2425_v63  ;;  %vm851_vm6 = vcmask 130048   ;;  %vm853_vm7 = vcmask 195584   ;;  %vm855_vm8 = vcmask 261120   ;;  %vm857_vm9 = vcmask 326656  }
  0x31   : > { %s563_s27 = scalar_lea.vmem %s3000_s7, %s2751_s23  ;;  %s568_s20 = scalar_lea.vmem %s3001_s8, %s2751_s23  ;;  %vm859_vm10 = vcmask 392192   ;;  %vm861_vm11 = vcmask 457728   ;;  %vm1712_vm12 = vcmask 1043456   ;;  %vm1782_vm13 = vcmask 57344  }
  0x32   : > { %s558_s30 = scalar_lea.vmem %s3027_s0, %s2751_s23  ;;  %s3014_s5 = smov 72  }
  0x33   : > { %v595_v1 = vld [vmem:[%s558_s30] sm:$0xff]  ;;  %v596_v2 = vld [vmem:[%s558_s30 + $0x8] sm:$0xff]  ;;  %v2412_v7 = vld [vmem:[%s3028_s1 + $0x38] sm:$0xff]   ;;  %s573_s30 = scalar_lea.vmem %s3002_s9, %s2751_s23  ;;  %s2587_s23 = smov 104  }
  0x34   : > { %v601_v3 = vrot.slane %v596_v2, 7  ;;  %v2387_v4 = vpack.i.bf16 %v596_v2, %v595_v1  ;;  %v600_v5 = vrot.slane %v595_v1, 7  ;;  %v607_v6 = vrot.slane %v595_v1, 1  ;;  %731 = vmatpush1.bf16.msra.mxu0 %v2412_v7  ;;  %v2413_v9 = vld [vmem:[%s3028_s1 + $0x30] sm:$0xff]   ;;  %v2414_v14 = vld [vmem:[%s3028_s1 + $0x28] sm:$0xff]   ;;  %v2415_v15 = vld [vmem:[%s3028_s1 + $0x20] sm:$0xff]  }
  0x35   : > { %v608_v8 = vrot.slane %v596_v2, 1  ;;  %732 = vmatprep.subr.bf16.mxu0 %v2583_v0  ;;  %v2416_v16 = vld [vmem:[%s3028_s1 + $0x18] sm:$0xff]   ;;  %v2417_v17 = vld [vmem:[%s3028_s1 + $0x10] sm:$0xff]   ;;  %v2418_v18 = vld [vmem:[%s3028_s1 + $0x8] sm:$0xff]  }
  0x36   : > { %2388 = vrot.lane.b32.xlu0 %v2387_v4, %s3010_s26  ;;  %v602_v10 = vsel %vm599_vm1, %v600_v5, %v601_v3  ;;  %v2419_v19 = vld [vmem:[%s3028_s1] sm:$0xff]   ;;  %v2420_v20 = vld [vmem:[%s3028_s1 + $0x58] sm:$0xff]   ;;  %v2421_v21 = vld [vmem:[%s3028_s1 + $0x50] sm:$0xff]   ;;  %v605_v25 = vsel %vm599_vm1, 0.0, %v600_v5  ;;  %s3032_s26 = smov 72  }
  0x37   : > { %v609_v11 = vsel %vm606_vm0, %v607_v6, %v608_v8  ;;  %v612_v12 = vsel %vm606_vm0, %v608_v8, 0.0  ;;  %v2422_v22 = vld [vmem:[%s3028_s1 + $0x48] sm:$0xff]   ;;  %v2423_v23 = vld [vmem:[%s3028_s1 + $0x40] sm:$0xff]   ;;  %s2585_s1 = smov 112   ;;  %v2427_v1 = vld [vmem:[#allocation2 + $0x30] sm:$0xff]  }
  0x38   : > { %v623_v13 = vpack.c.bf16 %v612_v12, %v609_v11  ;;  %733 = vmatpush1.bf16.msra.mxu0 %v2413_v9  ;;  %v2428_v2 = vld [vmem:[#allocation2 + $0x68] sm:$0xff]   ;;  %v2430_v4 = vld [vmem:[#allocation2 + $0x60] sm:$0xff]   ;;  %v2432_v6 = vld [vmem:[#allocation2 + $0x58] sm:$0xff]  }
  0x39   : > { %734 = vmatprep.subr.bf16.mxu0 %v2583_v0  ;;  %v2429_v3 = vld [vmem:[#allocation2 + $0x28] sm:$0xff]   ;;  %v2431_v5 = vld [vmem:[#allocation2 + $0x20] sm:$0xff]   ;;  %v2433_v7 = vld [vmem:[#allocation2 + $0x18] sm:$0xff]  }
  0x3a   : > { %2150 = vmatprep.mubr.msk.bf16.mxu0 %vm619_vm2, %v623_v13  ;;  %v2434_v8 = vld [vmem:[#allocation2 + $0x50] sm:$0xff]   ;;  %v2437_v11 = vld [vmem:[#allocation2 + $0x8] sm:$0xff]  }
  0x3b   : > { %v2435_v9 = vld [vmem:[#allocation2 + $0x10] sm:$0xff]  }
  0x3c   : > { %735 = vmatpush1.bf16.msra.mxu0 %v2414_v14 }
  0x3d   : > { %736 = vmatprep.subr.bf16.mxu0 %v2583_v0 }
  0x40   : > { %737 = vmatpush1.bf16.msra.mxu0 %v2415_v15 }
  0x41   : > { %738 = vmatprep.subr.bf16.mxu0 %v2583_v0 }
  0x44   : > { %739 = vmatpush1.bf16.msra.mxu0 %v2416_v16 }
  0x45   : > { %740 = vmatprep.subr.bf16.mxu0 %v2583_v0 }
  0x48   : > { %741 = vmatpush1.bf16.msra.mxu0 %v2417_v17 }
  0x49   : > { %742 = vmatprep.subr.bf16.mxu0 %v2583_v0 }
  0x4c   : > { %743 = vmatpush1.bf16.msra.mxu0 %v2418_v18 }
  0x4d   : > { %744 = vmatprep.subr.bf16.mxu0 %v2583_v0 }
  0x50   : > { %745 = vmatpush1.bf16.msra.mxu0 %v2419_v19 }
  0x51   : > { %754 = vmatprep.subr.bf16.mxu0 %v2583_v0 }
  0x54   : > { %755 = vmatpush2.bf16.msra.mxu0 %v2420_v20 }
  0x55   : > { %756 = vmatprep.subr.bf16.mxu0 %v2583_v0 }
  0x58   : > { %757 = vmatpush2.bf16.msra.mxu0 %v2421_v21 }
  0x59   : > { %758 = vmatprep.subr.bf16.mxu0 %v2583_v0 }
  0x5c   : > { %759 = vmatpush2.bf16.msra.mxu0 %v2422_v22 }
  0x5d   : > { %760 = vmatprep.subr.bf16.mxu0 %v2583_v0  ;;  %v2426_v0 = vld [vmem:[#allocation2 + $0x70] sm:$0xff]  }
  0x5e   : > { %2233 = vmatprep.subr.bf16.mxu1 %v2426_v0 }
  0x5f   : > { %2234 = vmatpush3.bf16.msra.mxu1 %v2427_v1 }
  0x60   : > { %761 = vmatpush2.bf16.msra.mxu0 %v2423_v23  ;;  %2235 = vmatprep.subr.bf16.mxu1 %v2428_v2 }
  0x63   : > { %2236 = vmatpush3.bf16.msra.mxu1 %v2429_v3 }
  0x64   : > { %2237 = vmatprep.subr.bf16.mxu1 %v2430_v4 }
  0x67   : > { %2238 = vmatpush3.bf16.msra.mxu1 %v2431_v5 }
  0x68   : > { %2239 = vmatprep.subr.bf16.mxu1 %v2432_v6 }
  0x6b   : > { %2240 = vmatpush3.bf16.msra.mxu1 %v2433_v7 }
  0x6c   : > { %2241 = vmatprep.subr.bf16.mxu1 %v2434_v8  ;;  %v2440_v8 = vld [vmem:[#allocation2 + $0xf8] sm:$0xff]  }
  0x6f   : > { %2242 = vmatpush3.bf16.msra.mxu1 %v2435_v9  ;;  %v2441_v9 = vld [vmem:[#allocation2 + $0xb8] sm:$0xff]  }
  0xa8   : > { %v2389_v24 = vpop.permute.xlu0 %2388 }
  0xa9   : > { %v2391_v26 = vunpack.i.h.bf16 %v2389_v24  ;;  %v2390_v27 = vunpack.i.l.bf16 %v2389_v24 }
  0xab   : > { %v620_v28 = vsel %vm619_vm2, %v605_v25, %v2390_v27  ;;  %v621_v29 = vsel %vm619_vm2, %v602_v10, %v2391_v26  ;;  %v2436_v10 = vld [vmem:[#allocation2 + $0x48] sm:$0xff]   ;;  %v2438_v27 = vld [vmem:[#allocation2 + $0x40] sm:$0xff]  }
  0xac   : > { %v622_v30 = vpack.c.bf16 %v621_v29, %v620_v28  ;;  %2243 = vmatprep.subr.bf16.mxu1 %v2436_v10  ;;  %v2439_v28 = vld [vmem:[#allocation2] sm:$0xff]   ;;  %v2442_v10 = vld [vmem:[#allocation2 + $0xf0] sm:$0xff]  }
  0xad   : > { %2244 = vmatpush3.bf16.msra.mxu1 %v2437_v11  ;;  %v2443_v11 = vld [vmem:[#allocation2 + $0xb0] sm:$0xff]  }
  0xae   : > { %763 = vmatmul.mubr.bf16.vlgmr.msra.gmra.mxu0 %v622_v30  ;;  %2245 = vmatprep.subr.bf16.mxu1 %v2438_v27 }
  0xb1   : > { %2246 = vmatpush3.bf16.msra.mxu1 %v2439_v28 }
  0xb2   : > { %2253 = vmatprep.subr.bf16.mxu1 %v2440_v8 }
 0x16e   : > { %v764_v32 = vpop.f32.mrf.mxu0 }
 0x16f   : > { %v765_v34 = vadd.f32 %v2137_v31, %v764_v32 }
 0x170   : > { %v766_v36 = vpop.f32.mrf.mxu0 }
 0x171   : > { %v778_v37 = vmul.f32 %v2151_v33, %v765_v34  ;;  %791 = vst [vmem:[%s563_s27] sm:$0xff] %v765_v34 }
 0x172   : > { %v767_v38 = vpop.f32.mrf.mxu0 }
 0x173   : > { %v787_v39 = vadd.f32 %v2152_v35, %v778_v37  ;;  %v768_v40 = vadd.f32 %v2137_v31, %v767_v38 }
 0x174   : > { %v769_v41 = vpop.f32.mrf.mxu0 }
 0x175   : > { %v789_v42 = vmax.f32 %v787_v39, 0.0  ;;  %793 = vst [vmem:[%s568_s20] sm:$0xff] %v787_v39  ;;  %v779_v43 = vmul.f32 %v2151_v33, %v768_v40  ;;  %792 = vst [vmem:[%s563_s27 + $0x8] sm:$0xff] %v768_v40  ;;  %s2588_s27 = smov 96  }
 0x177   : > { %795 = vst [vmem:[%s573_s30] sm:$0xff] %v789_v42  ;;  %v798_v44 = vrot.slane %v789_v42, 1  ;;  %v788_v45 = vadd.f32 %v2152_v35, %v779_v43 }
 0x179   : > { %v800_v46 = vmax.f32 %v789_v42, %v798_v44  ;;  %v790_v47 = vmax.f32 %v788_v45, 0.0  ;;  %794 = vst [vmem:[%s568_s20 + $0x8] sm:$0xff] %v788_v45  ;;  %s3029_s20 = smov 64  }
 0x17b   : > { %796 = vst [vmem:[%s573_s30 + $0x8] sm:$0xff] %v790_v47  ;;  %v802_v48 = vrot.slane %v790_v47, 1  ;;  %v806_v49 = vrot.slane %v800_v46, 3  ;;  %v818_v56 = vrot.slane %v800_v46, 2  ;;  %v820_v57 = vrot.slane %v800_v46, 5  ;;  %s2898_s30 = sshll.u32 %s2748_s16, 2 }
 0x17c   : > { %s585_s0 = scalar_lea.vmem %s3005_s12, %s2898_s30  ;;  %s2592_s16 = smov 48  }
 0x17d   : > { %v804_v50 = vmax.f32 %v790_v47, %v802_v48  ;;  %v813_v53 = vsel %vm599_vm1, %v800_v46, %v806_v49  ;;  %v824_v58 = vsel %vm599_vm1, %v818_v56, %v820_v57 }
 0x17f   : > { %v809_v51 = vrot.slane %v804_v50, 6  ;;  %v811_v52 = vrot.slane %v804_v50, 1  ;;  %v822_v59 = vrot.slane %v804_v50, 3  ;;  %v825_v60 = vsel %vm814_vm4, %v824_v58, %v804_v50 }
 0x181   : > { %v815_v54 = vsel %vm814_vm4, %v813_v53, %v809_v51  ;;  %v2834_v61 = vsel %vm816_vm3, %v825_v60, %v822_v59 }
 0x182   : > { %v817_v55 = vsel %vm816_vm3, %v815_v54, %v811_v52 }
 0x183   : > { %831 = vrot.lane.b32.xlu1 %v817_v55, %s2585_s1  ;;  %828 = vrot.lane.b32.xlu0 %v817_v55, %s2586_s24 }
 0x187   : > { %834 = vrot.lane.b32.xlu1 %v817_v55, %s2587_s23  ;;  %837 = vrot.lane.b32.xlu0 %v817_v55, %s2588_s27 }
 0x18b   : > { %840 = vrot.lane.b32.xlu1 %v817_v55, %s3015_s17  ;;  %843 = vrot.lane.b32.xlu0 %v817_v55, %s3016_s25 }
 0x18f   : > { %846 = vrot.lane.b32.xlu1 %v817_v55, %s3014_s5  ;;  %863 = vrot.lane.b32.xlu0 %v817_v55, %s3029_s20 }
 0x193   : > { %875 = vrot.lane.b32.xlu1 %v2834_v61, %s2586_s24  ;;  %878 = vrot.lane.b32.xlu0 %v2834_v61, %s2585_s1 }
 0x197   : > { %881 = vrot.lane.b32.xlu1 %v2834_v61, %s2587_s23  ;;  %884 = vrot.lane.b32.xlu0 %v2834_v61, %s2588_s27 }
 0x19b   : > { %887 = vrot.lane.b32.xlu1 %v2834_v61, %s3015_s17  ;;  %890 = vrot.lane.b32.xlu0 %v2834_v61, %s3016_s25  ;;  %s581_s25 = scalar_lea.vmem %s3004_s11, %s2898_s30  ;;  %s2593_s17 = smov 56  }
 0x19f   : > { %893 = vrot.lane.b32.xlu1 %v2834_v61, %s3014_s5  ;;  %903 = vrot.lane.b32.xlu0 %v2834_v61, %s3029_s20  ;;  %s589_s5 = scalar_lea.vmem %s3006_s13, %s2898_s30 }
 0x1f5   : > { %v832_v12 = vpop.permute.xlu1 %831  ;;  %v829_v13 = vpop.permute.xlu0 %828 }
 0x1f6   : > { %v850_v14 = vsel %vm849_vm5, %v817_v55, %v829_v13  ;;  %v866_v15 = vsel %vm849_vm5, %v829_v13, %v832_v12  ;;  %v2445_v13 = vld [vmem:[#allocation2 + $0xa8] sm:$0xff]  }
 0x1f7   : > { %v852_v17 = vsel %vm851_vm6, %v850_v14, %v832_v12  ;;  %v2444_v12 = vld [vmem:[#allocation2 + $0xe8] sm:$0xff]   ;;  %v2446_v14 = vld [vmem:[#allocation2 + $0xe0] sm:$0xff]  }
 0x1f9   : > { %v835_v16 = vpop.permute.xlu1 %834  ;;  %v838_v18 = vpop.permute.xlu0 %837 }
 0x1fa   : > { %v854_v19 = vsel %vm853_vm7, %v852_v17, %v835_v16  ;;  %v867_v20 = vsel %vm851_vm6, %v866_v15, %v835_v16  ;;  %v2447_v15 = vld [vmem:[#allocation2 + $0xa0] sm:$0xff]   ;;  %v2448_v16 = vld [vmem:[#allocation2 + $0xd8] sm:$0xff]  }
 0x1fb   : > { %v856_v21 = vsel %vm855_vm8, %v854_v19, %v838_v18  ;;  %v868_v22 = vsel %vm853_vm7, %v867_v20, %v838_v18  ;;  %v2449_v17 = vld [vmem:[#allocation2 + $0x98] sm:$0xff]   ;;  %v2450_v18 = vld [vmem:[#allocation2 + $0xd0] sm:$0xff]   ;;  %v2452_v20 = vld [vmem:[#allocation2 + $0xc8] sm:$0xff]  }
 0x1fc   : > { %v2451_v19 = vld [vmem:[#allocation2 + $0x90] sm:$0xff]  }
 0x1fd   : > { %v841_v23 = vpop.permute.xlu1 %840  ;;  %v844_v24 = vpop.permute.xlu0 %843 }
 0x1fe   : > { %v858_v25 = vsel %vm857_vm9, %v856_v21, %v841_v23  ;;  %v869_v26 = vsel %vm855_vm8, %v868_v22, %v841_v23  ;;  %v2453_v21 = vld [vmem:[#allocation2 + $0x88] sm:$0xff]   ;;  %v2454_v23 = vld [vmem:[#allocation2 + $0xc0] sm:$0xff]  }
 0x1ff   : > { %v860_v29 = vsel %vm859_vm10, %v858_v25, %v844_v24  ;;  %v870_v30 = vsel %vm857_vm9, %v869_v26, %v844_v24  ;;  %v2455_v24 = vld [vmem:[#allocation2 + $0x80] sm:$0xff]  }
 0x200   : > { %v2153_v25 = vld [vmem:[%s2999_s6] ss:$0 sm:$0xff] }
 0x201   : > { %v847_v31 = vpop.permute.xlu1 %846  ;;  %v864_v32 = vpop.permute.xlu0 %863 }
 0x202   : > { %v862_v33 = vsel %vm861_vm11, %v860_v29, %v847_v31  ;;  %v871_v34 = vsel %vm859_vm10, %v870_v30, %v847_v31 }
 0x203   : > { %v872_v35 = vsel %vm861_vm11, %v871_v34, %v864_v32 }
 0x204   : > { %v2866_v36 = vmax.f32 %v862_v33, %v872_v35 }
 0x205   : > { %v876_v37 = vpop.permute.xlu1 %875  ;;  %v879_v38 = vpop.permute.xlu0 %878 }
 0x206   : > { %v896_v39 = vsel %vm849_vm5, %v2834_v61, %v876_v37  ;;  %v924_v40 = vrot.slane %v2866_v36, 1  ;;  %v906_v43 = vsel %vm849_vm5, %v876_v37, %v879_v38 }
 0x207   : > { %v897_v41 = vsel %vm851_vm6, %v896_v39, %v879_v38 }
 0x208   : > { %v926_v42 = vsel %vm816_vm3, %v924_v40, 0.0 }
 0x209   : > { %v882_v44 = vpop.permute.xlu1 %881  ;;  %v885_v45 = vpop.permute.xlu0 %884  ;;  %v2392_v46 = vpack.i.bf16 %v2866_v36, %v926_v42 }
 0x20a   : > { %v898_v47 = vsel %vm853_vm7, %v897_v41, %v882_v44  ;;  %v907_v48 = vsel %vm851_vm6, %v906_v43, %v882_v44 }
 0x20b   : > { %v899_v49 = vsel %vm855_vm8, %v898_v47, %v885_v45  ;;  %v908_v50 = vsel %vm853_vm7, %v907_v48, %v885_v45  ;;  %2393 = vrot.lane.b32.xlu1 %v2392_v46, %s3029_s20  ;;  %v2456_v46 = vld [vmem:[#allocation2 + $0x178] sm:$0xff]   ;;  %v2458_v48 = vld [vmem:[#allocation2 + $0x170] sm:$0xff]  }
 0x20c   : > { %v2457_v47 = vld [vmem:[#allocation2 + $0x138] sm:$0xff]   ;;  %2275 = vmatprep.subr.bf16.mxu0 %v2456_v46 }
 0x20d   : > { %v888_v51 = vpop.permute.xlu1 %887  ;;  %v891_v52 = vpop.permute.xlu0 %890  ;;  %2276 = vmatpush3.bf16.msra.mxu0 %v2457_v47 }
 0x20e   : > { %v900_v53 = vsel %vm857_vm9, %v899_v49, %v888_v51  ;;  %v909_v54 = vsel %vm855_vm8, %v908_v50, %v888_v51  ;;  %v2459_v49 = vld [vmem:[#allocation2 + $0x130] sm:$0xff]   ;;  %2277 = vmatprep.subr.bf16.mxu0 %v2458_v48  ;;  %v2460_v50 = vld [vmem:[#allocation2 + $0x168] sm:$0xff]  }
 0x20f   : > { %v901_v55 = vsel %vm859_vm10, %v900_v53, %v891_v52  ;;  %v910_v56 = vsel %vm857_vm9, %v909_v54, %v891_v52  ;;  %v2461_v51 = vld [vmem:[#allocation2 + $0x128] sm:$0xff]   ;;  %v2462_v52 = vld [vmem:[#allocation2 + $0x160] sm:$0xff]   ;;  %v2464_v54 = vld [vmem:[#allocation2 + $0x158] sm:$0xff]  }
 0x210   : > { %v2463_v53 = vld [vmem:[#allocation2 + $0x120] sm:$0xff]  }
 0x211   : > { %v894_v57 = vpop.permute.xlu1 %893  ;;  %v904_v58 = vpop.permute.xlu0 %903  ;;  %2278 = vmatpush3.bf16.msra.mxu0 %v2459_v49 }
 0x212   : > { %v902_v59 = vsel %vm861_vm11, %v901_v55, %v894_v57  ;;  %v911_v60 = vsel %vm859_vm10, %v910_v56, %v894_v57  ;;  %2279 = vmatprep.subr.bf16.mxu0 %v2460_v50  ;;  %v2465_v55 = vld [vmem:[#allocation2 + $0x118] sm:$0xff]   ;;  %v2466_v56 = vld [vmem:[#allocation2 + $0x150] sm:$0xff]  }
 0x213   : > { %v912_v61 = vsel %vm861_vm11, %v911_v60, %v904_v58  ;;  %v2467_v57 = vld [vmem:[#allocation2 + $0x110] sm:$0xff]   ;;  %v2468_v58 = vld [vmem:[#allocation2 + $0x148] sm:$0xff]  }
 0x214   : > { %v2887_v62 = vmax.f32 %v902_v59, %v912_v61  ;;  %v2469_v59 = vld [vmem:[#allocation2 + $0x108] sm:$0xff]   ;;  %v2470_v61 = vld [vmem:[#allocation2 + $0x140] sm:$0xff]  }
 0x215   : > { %2280 = vmatpush3.bf16.msra.mxu0 %v2461_v51 }
 0x216   : > { %v920_v63 = vrot.slane %v2887_v62, 7  ;;  %2281 = vmatprep.subr.bf16.mxu0 %v2462_v52 }
 0x218   : > { %v922_v3 = vsel %vm599_vm1, 0.0, %v920_v63  ;;  %v2471_v63 = vld [vmem:[#allocation2 + $0x100] sm:$0xff]  }
 0x219   : > { %2282 = vmatpush3.bf16.msra.mxu0 %v2463_v53 }
 0x21a   : > { %2283 = vmatprep.subr.bf16.mxu0 %v2464_v54 }
 0x21d   : > { %2284 = vmatpush3.bf16.msra.mxu0 %v2465_v55 }
 0x21e   : > { %2285 = vmatprep.subr.bf16.mxu0 %v2466_v56 }
 0x221   : > { %2286 = vmatpush3.bf16.msra.mxu0 %v2467_v57 }
 0x222   : > { %2287 = vmatprep.subr.bf16.mxu0 %v2468_v58 }
 0x225   : > { %2288 = vmatpush3.bf16.msra.mxu0 %v2469_v59  ;;  %v2207_v59 = vld [vmem:[%s2999_s6 + $0x3] ss:$0 sm:$0xff] }
 0x226   : > { %2289 = vmatprep.subr.bf16.mxu0 %v2470_v61 }
 0x229   : > { %2290 = vmatpush3.bf16.msra.mxu0 %v2471_v63 }
 0x27d   : > { %v2394_v0 = vpop.permute.xlu1 %2393 }
 0x27e   : > { %v2396_v1 = vunpack.i.h.bf16 %v2394_v0  ;;  %v2395_v2 = vunpack.i.l.bf16 %v2394_v0  ;;  %v2171_v0 = vld [vmem:[%s2999_s6 + $0x1] ss:$0 sm:$0xff] }
 0x280   : > { %v935_v4 = vsel %vm619_vm2, %v2887_v62, %v2395_v2  ;;  %v934_v5 = vsel %vm619_vm2, %v922_v3, %v2396_v1 }
 0x281   : > { %v937_v6 = vpack.c.bf16 %v935_v4, %v935_v4  ;;  %v936_v7 = vpack.c.bf16 %v934_v5, %v934_v5 }
 0x283   : > { %1105 = vmatprep.mubr.bf16.mxu1 %v937_v6 }
 0x284   : > { %1106 = vmatmul.mubr.bf16.vlgmr.msra.gmra.mxu1 %v936_v7 }
 0x285   : > { %2254 = vmatpush3.bf16.msra.mxu1 %v2441_v9 }
 0x286   : > { %2255 = vmatprep.subr.bf16.mxu1 %v2442_v10 }
 0x289   : > { %2256 = vmatpush3.bf16.msra.mxu1 %v2443_v11 }
 0x28a   : > { %2257 = vmatprep.subr.bf16.mxu1 %v2444_v12 }
 0x28d   : > { %2258 = vmatpush3.bf16.msra.mxu1 %v2445_v13 }
 0x28e   : > { %2259 = vmatprep.subr.bf16.mxu1 %v2446_v14 }
 0x291   : > { %2260 = vmatpush3.bf16.msra.mxu1 %v2447_v15 }
 0x292   : > { %2261 = vmatprep.subr.bf16.mxu1 %v2448_v16 }
 0x295   : > { %2262 = vmatpush3.bf16.msra.mxu1 %v2449_v17 }
 0x296   : > { %2263 = vmatprep.subr.bf16.mxu1 %v2450_v18 }
 0x299   : > { %2264 = vmatpush3.bf16.msra.mxu1 %v2451_v19 }
 0x29a   : > { %2265 = vmatprep.subr.bf16.mxu1 %v2452_v20  ;;  %v2472_v20 = vld [vmem:[#allocation2 + $0x1f8] sm:$0xff]  }
 0x29d   : > { %2266 = vmatpush3.bf16.msra.mxu1 %v2453_v21  ;;  %v2473_v21 = vld [vmem:[#allocation2 + $0x1b8] sm:$0xff]  }
 0x29e   : > { %2267 = vmatprep.subr.bf16.mxu1 %v2454_v23  ;;  %v2475_v23 = vld [vmem:[#allocation2 + $0x1b0] sm:$0xff]  }
 0x2a1   : > { %2268 = vmatpush3.bf16.msra.mxu1 %v2455_v24  ;;  %v2476_v24 = vld [vmem:[#allocation2 + $0x1e8] sm:$0xff]  }
 0x2a2   : > { %2297 = vmatprep.subr.bf16.mxu1 %v2472_v20 }
 0x344   : > { %v2247_v22 = vpop.f32.mrf.mxu1 }
 0x346   : > { %v2248_v26 = vpop.f32.mrf.mxu1 }
 0x347   : > { %v2249_v27 = vadd.f32 %v2248_v26, %v2247_v22  ;;  %v2474_v22 = vld [vmem:[#allocation2 + $0x1f0] sm:$0xff]   ;;  %v2478_v26 = vld [vmem:[#allocation2 + $0x1e0] sm:$0xff]  }
 0x348   : > { %v2250_v28 = vpop.f32.mrf.mxu1 }
 0x349   : > { %v1108_v29 = vadd.f32 %v2249_v27, %v2153_v25  ;;  %v2477_v25 = vld [vmem:[#allocation2 + $0x1a8] sm:$0xff]   ;;  %v2479_v27 = vld [vmem:[#allocation2 + $0x1a0] sm:$0xff]   ;;  %v2480_v28 = vld [vmem:[#allocation2 + $0x1d8] sm:$0xff]  }
 0x34a   : > { %v2251_v30 = vpop.f32.mrf.mxu1 }
 0x34b   : > { %v1113_v31 = vmax.f32 %v1108_v29, 0.0  ;;  %v2481_v29 = vld [vmem:[#allocation2 + $0x198] sm:$0xff]   ;;  %v2482_v30 = vld [vmem:[#allocation2 + $0x1d0] sm:$0xff]  }
 0x34d   : > { %1114 = vst [vmem:[%s581_s25] sm:$0xf] %v1113_v31  ;;  %v1121_v32 = vrot.slane %v1113_v31, 1  ;;  %v1116_v33 = vrot.slane %v1113_v31, 7  ;;  %s593_s25 = scalar_lea.vmem %s3007_s14, %s2898_s30 }
 0x34f   : > { %v1123_v34 = vsel %vm816_vm3, %v1121_v32, 0.0  ;;  %v2397_v35 = vpack.i.bf16 %v1113_v31, %v1116_v33  ;;  %v2483_v31 = vld [vmem:[#allocation2 + $0x190] sm:$0xff]   ;;  %v2484_v32 = vld [vmem:[#allocation2 + $0x1c8] sm:$0xff]  }
 0x350   : > { %1128 = vrot.lane.b32.xlu1 %v1123_v34, %s3029_s20  ;;  %v2485_v33 = vld [vmem:[#allocation2 + $0x188] sm:$0xff]  }
 0x351   : > { %2398 = vrot.lane.b32.xlu0 %v2397_v35, %s3029_s20  ;;  %v2486_v35 = vld [vmem:[#allocation2 + $0x1c0] sm:$0xff]  }
 0x3c2   : > { %v1129_v40 = vpop.permute.xlu1 %1128 }
 0x3c3   : > { %v2399_v37 = vpop.permute.xlu0 %2398 }
 0x3c4   : > { %v2401_v38 = vunpack.i.h.bf16 %v2399_v37  ;;  %v2400_v39 = vunpack.i.l.bf16 %v2399_v37  ;;  %v2487_v37 = vld [vmem:[#allocation2 + $0x180] sm:$0xff]  }
 0x3c6   : > { %v1120_v41 = vsel %vm599_vm1, 0.0, %v2400_v39  ;;  %v1132_v42 = vsel %vm619_vm2, %v2401_v38, %v1129_v40 }
 0x3c7   : > { %v1131_v43 = vsel %vm619_vm2, %v1120_v41, %v2401_v38  ;;  %v1134_v44 = vpack.c.bf16 %v1132_v42, %v1132_v42  ;;  %v2189_v38 = vld [vmem:[%s2999_s6 + $0x2] ss:$0 sm:$0xff] }
 0x3c8   : > { %v1133_v45 = vpack.c.bf16 %v1131_v43, %v1131_v43 }
 0x3c9   : > { %1304 = vmatprep.mubr.bf16.mxu1 %v1134_v44 }
 0x3ca   : > { %1305 = vmatmul.mubr.bf16.vlgmr.msra.gmra.mxu1 %v1133_v45 }
 0x3cb   : > { %2298 = vmatpush3.bf16.msra.mxu1 %v2473_v21 }
 0x3cc   : > { %2299 = vmatprep.subr.bf16.mxu1 %v2474_v22 }
 0x3cf   : > { %2300 = vmatpush3.bf16.msra.mxu1 %v2475_v23 }
 0x3d0   : > { %2301 = vmatprep.subr.bf16.mxu1 %v2476_v24 }
 0x3d3   : > { %2302 = vmatpush3.bf16.msra.mxu1 %v2477_v25 }
 0x3d4   : > { %2303 = vmatprep.subr.bf16.mxu1 %v2478_v26 }
 0x3d7   : > { %2304 = vmatpush3.bf16.msra.mxu1 %v2479_v27 }
 0x3d8   : > { %2305 = vmatprep.subr.bf16.mxu1 %v2480_v28 }
 0x3db   : > { %2306 = vmatpush3.bf16.msra.mxu1 %v2481_v29 }
 0x3dc   : > { %2307 = vmatprep.subr.bf16.mxu1 %v2482_v30 }
 0x3df   : > { %2308 = vmatpush3.bf16.msra.mxu1 %v2483_v31 }
 0x3e0   : > { %2309 = vmatprep.subr.bf16.mxu1 %v2484_v32 }
 0x3e3   : > { %2310 = vmatpush3.bf16.msra.mxu1 %v2485_v33 }
 0x3e4   : > { %2311 = vmatprep.subr.bf16.mxu1 %v2486_v35 }
 0x3e7   : > { %2312 = vmatpush3.bf16.msra.mxu1 %v2487_v37 }
 0x48a   : > { %v2269_v60 = vpop.f32.mrf.mxu1 }
 0x48c   : > { %v2270_v1 = vpop.f32.mrf.mxu1 }
 0x48d   : > { %v2271_v2 = vadd.f32 %v2270_v1, %v2269_v60 }
 0x48e   : > { %v2272_v3 = vpop.f32.mrf.mxu1 }
 0x48f   : > { %v1307_v4 = vadd.f32 %v2271_v2, %v2171_v0 }
 0x490   : > { %v2273_v5 = vpop.f32.mrf.mxu1 }
 0x491   : > { %v1312_v6 = vmax.f32 %v1307_v4, 0.0 }
 0x493   : > { %1313 = vst [vmem:[%s585_s0] sm:$0xf] %v1312_v6  ;;  %v1320_v7 = vrot.slane %v1312_v6, 1  ;;  %v1315_v8 = vrot.slane %v1312_v6, 7  ;;  %s3031_s0 = smov 88  }
 0x495   : > { %v1322_v9 = vsel %vm816_vm3, %v1320_v7, 0.0  ;;  %v2402_v10 = vpack.i.bf16 %v1312_v6, %v1315_v8 }
 0x496   : > { %1327 = vrot.lane.b32.xlu1 %v1322_v9, %s3029_s20 }
 0x497   : > { %2403 = vrot.lane.b32.xlu0 %v2402_v10, %s3029_s20 }
 0x508   : > { %v1328_v14 = vpop.permute.xlu1 %1327 }
 0x509   : > { %v2404_v11 = vpop.permute.xlu0 %2403 }
 0x50a   : > { %v2406_v12 = vunpack.i.h.bf16 %v2404_v11  ;;  %v2405_v13 = vunpack.i.l.bf16 %v2404_v11 }
 0x50c   : > { %v1319_v15 = vsel %vm599_vm1, 0.0, %v2405_v13  ;;  %v1331_v16 = vsel %vm619_vm2, %v2406_v12, %v1328_v14 }
 0x50d   : > { %v1330_v17 = vsel %vm619_vm2, %v1319_v15, %v2406_v12  ;;  %v1333_v18 = vpack.c.bf16 %v1331_v16, %v1331_v16 }
 0x50e   : > { %v1332_v19 = vpack.c.bf16 %v1330_v17, %v1330_v17 }
 0x50f   : > { %1503 = vmatprep.mubr.bf16.mxu0 %v1333_v18 }
 0x510   : > { %1504 = vmatmul.mubr.bf16.vlgmr.msra.gmra.mxu0 %v1332_v19 }
 0x5d0   : > { %v2291_v34 = vpop.f32.mrf.mxu0 }
 0x5d2   : > { %v2292_v39 = vpop.f32.mrf.mxu0 }
 0x5d3   : > { %v2293_v40 = vadd.f32 %v2292_v39, %v2291_v34 }
 0x5d4   : > { %v2294_v41 = vpop.f32.mrf.mxu0 }
 0x5d5   : > { %v1506_v42 = vadd.f32 %v2293_v40, %v2189_v38 }
 0x5d6   : > { %v2295_v43 = vpop.f32.mrf.mxu0 }
 0x5d7   : > { %v1511_v44 = vmax.f32 %v1506_v42, 0.0 }
 0x5d9   : > { %1512 = vst [vmem:[%s589_s5] sm:$0xf] %v1511_v44  ;;  %v1519_v45 = vrot.slane %v1511_v44, 1  ;;  %v1514_v46 = vrot.slane %v1511_v44, 7  ;;  %s3030_s5 = smov 80  }
 0x5db   : > { %v1521_v47 = vsel %vm816_vm3, %v1519_v45, 0.0  ;;  %v2407_v48 = vpack.i.bf16 %v1511_v44, %v1514_v46 }
 0x5dc   : > { %1526 = vrot.lane.b32.xlu1 %v1521_v47, %s3029_s20 }
 0x5dd   : > { %2408 = vrot.lane.b32.xlu0 %v2407_v48, %s3029_s20 }
 0x64e   : > { %v1527_v52 = vpop.permute.xlu1 %1526 }
 0x64f   : > { %v2409_v49 = vpop.permute.xlu0 %2408 }
 0x650   : > { %v2411_v50 = vunpack.i.h.bf16 %v2409_v49  ;;  %v2410_v51 = vunpack.i.l.bf16 %v2409_v49 }
 0x652   : > { %v1518_v53 = vsel %vm599_vm1, 0.0, %v2410_v51  ;;  %v1530_v54 = vsel %vm619_vm2, %v2411_v50, %v1527_v52 }
 0x653   : > { %v1529_v55 = vsel %vm619_vm2, %v1518_v53, %v2411_v50  ;;  %v1532_v56 = vpack.c.bf16 %v1530_v54, %v1530_v54 }
 0x654   : > { %v1531_v57 = vpack.c.bf16 %v1529_v55, %v1529_v55 }
 0x655   : > { %1702 = vmatprep.mubr.bf16.mxu1 %v1532_v56 }
 0x656   : > { %1703 = vmatmul.mubr.bf16.vlgmr.msra.gmra.mxu1 %v1531_v57 }
 0x716   : > { %v2313_v58 = vpop.f32.mrf.mxu1 }
 0x718   : > { %v2314_v60 = vpop.f32.mrf.mxu1 }
 0x719   : > { %v2315_v61 = vadd.f32 %v2314_v60, %v2313_v58 }
 0x71a   : > { %v2316_v63 = vpop.f32.mrf.mxu1 }
 0x71b   : > { %v1705_v0 = vadd.f32 %v2315_v61, %v2207_v59 }
 0x71c   : > { %v2317_v1 = vpop.f32.mrf.mxu1 }
 0x71d   : > { %v1710_v2 = vmax.f32 %v1705_v0, 0.0 }
 0x71f   : > { %1711 = vst [vmem:[%s593_s25] sm:$0xf] %v1710_v2  ;;  %v1713_v3 = vsel %vm1712_vm12, %v1710_v2, 0.0  ;;  %s2594_s25 = smov 32  }
 0x720   : > { %v1714_v4 = vrot.slane %v1713_v3, 4 }
 0x722   : > { %v1715_v5 = vadd.f32 %v1714_v4, %v1713_v3 }
 0x724   : > { %v1716_v6 = vrot.slane %v1715_v5, 2 }
 0x726   : > { %v1717_v7 = vadd.f32 %v1716_v6, %v1715_v5 }
 0x728   : > { %v1718_v8 = vrot.slane %v1717_v7, 1 }
 0x72a   : > { %v1719_v9 = vadd.f32 %v1718_v8, %v1717_v7 }
 0x72c   : > { %1725 = vrot.lane.b32.xlu1 %v1719_v9, %s2585_s1  ;;  %1721 = vrot.lane.b32.xlu0 %v1719_v9, %s2586_s24  ;;  %s2595_s1 = smov 40   ;;  %s2596_s24 = smov 16  }
 0x730   : > { %1733 = vrot.lane.b32.xlu1 %v1719_v9, %s2588_s27  ;;  %1729 = vrot.lane.b32.xlu0 %v1719_v9, %s2587_s23  ;;  %s2597_s27 = smov 24   ;;  %s2598_s23 = smov 8  }
 0x734   : > { %1741 = vrot.lane.b32.xlu1 %v1719_v9, %s3030_s5  ;;  %1737 = vrot.lane.b32.xlu0 %v1719_v9, %s3031_s0 }
 0x738   : > { %1749 = vrot.lane.b32.xlu1 %v1719_v9, %s3029_s20  ;;  %1745 = vrot.lane.b32.xlu0 %v1719_v9, %s3032_s26  ;;  %s577_s26 = scalar_lea.vmem %s3003_s10, %s2898_s30 }
 0x73c   : > { %1757 = vrot.lane.b32.xlu1 %v1719_v9, %s2592_s16  ;;  %1753 = vrot.lane.b32.xlu0 %v1719_v9, %s2593_s17  ;;  %s2224_s16 = sshll.u32 %s2701_s22, 4  ;;  %s2599_s22 = smov [#allocation5]  }
 0x73d   : > { %s2518_s5 = sshll.u32 %s2599_s22, 4  ;;  %s2519_s5 = int_to_ptr.vmem [resolvable:$false] %s2518_s5 }
 0x73e   : > { %s2520_s0 = scalar_lea.vmem %s2519_s5, 32 }
 0x740   : > { %1765 = vrot.lane.b32.xlu1 %v1719_v9, %s2594_s25  ;;  %1761 = vrot.lane.b32.xlu0 %v1719_v9, %s2595_s1 }
 0x744   : > { %1773 = vrot.lane.b32.xlu1 %v1719_v9, %s2596_s24  ;;  %1769 = vrot.lane.b32.xlu0 %v1719_v9, %s2597_s27  ;;  %s1854_s27 = scalar_lea.hbm %s3008_s15, %s2224_s16 }
 0x748   : > { %915 = vrot.lane.b32.xlu1 %v2887_v62, %s3029_s20  ;;  %1777 = vrot.lane.b32.xlu0 %v1719_v9, %s2598_s23  ;;  %s552_s20 = sand.u32 1, %s2570_s19  }
 0x749   : > { %s553_s17 = scalar_lea.vmem [#allocation5], %s552_s20  ;;  %s1820_s30 = scalar_lea.sflag [#allocation4], %s552_s20 }
 0x74a   : > { %s1856_s25 = sshll.u32 %s553_s17, 4  ;;  %s1857_s25 = int_to_ptr.vmem [resolvable:$true] %s1856_s25 }
 0x74b   : > { %s2514_s23 = scalar_lea.vmem %s1857_s25, 16  ;;  %p2521_p11 = scmp.lt.s32.totalorder %s1857_s25, %s2519_s5 }
 0x74c   : > { %p2515_p6 = scmp.ne.s32.totalorder %s1857_s25, %s2514_s23  ;;  %p2522_p12 = scmp.lt.s32.totalorder %s2520_s0, %s2514_s23 }
 0x74e   : > { %p2516_p9 = pnand %p2515_p6, %p2718_p5  ;;  %p2523_p13 = por %p2522_p12, %p2521_p11 }
 0x750   : > { %p2517_p10 = pneg %p2516_p9 }
 0x752   : > { %p2524_p0 = pnand %p2523_p13, %p2517_p10 }
 0x79e   : > { %v1726_v10 = vpop.permute.xlu1 %1725  ;;  %v1722_v11 = vpop.permute.xlu0 %1721 }
 0x79f   : > { %v1724_v12 = vadd.f32 %v1722_v11, %v1719_v9 }
 0x7a1   : > { %v1728_v13 = vadd.f32 %v1726_v10, %v1724_v12 }
 0x7a2   : > { %v1734_v14 = vpop.permute.xlu1 %1733  ;;  %v1730_v15 = vpop.permute.xlu0 %1729 }
 0x7a3   : > { %v1732_v16 = vadd.f32 %v1730_v15, %v1728_v13 }
 0x7a5   : > { %v1736_v17 = vadd.f32 %v1734_v14, %v1732_v16 }
 0x7a6   : > { %v1742_v18 = vpop.permute.xlu1 %1741  ;;  %v1738_v19 = vpop.permute.xlu0 %1737 }
 0x7a7   : > { %v1740_v20 = vadd.f32 %v1738_v19, %v1736_v17 }
 0x7a9   : > { %v1744_v21 = vadd.f32 %v1742_v18, %v1740_v20 }
 0x7aa   : > { %v1750_v22 = vpop.permute.xlu1 %1749  ;;  %v1746_v23 = vpop.permute.xlu0 %1745 }
 0x7ab   : > { %v1748_v24 = vadd.f32 %v1746_v23, %v1744_v21 }
 0x7ad   : > { %v1752_v62 = vadd.f32 %v1750_v22, %v1748_v24 }
 0x7ae   : > { %v1758_v25 = vpop.permute.xlu1 %1757  ;;  %v1754_v26 = vpop.permute.xlu0 %1753 }
 0x7af   : > { %v1756_v27 = vadd.f32 %v1754_v26, %v1752_v62 }
 0x7b1   : > { %v1760_v28 = vadd.f32 %v1758_v25, %v1756_v27 }
 0x7b2   : > { %v1766_v29 = vpop.permute.xlu1 %1765  ;;  %v1762_v30 = vpop.permute.xlu0 %1761 }
 0x7b3   : > { %v1764_v31 = vadd.f32 %v1762_v30, %v1760_v28 }
 0x7b5   : > { %v1768_v32 = vadd.f32 %v1766_v29, %v1764_v31 }
 0x7b6   : > { %v1774_v33 = vpop.permute.xlu1 %1773  ;;  %v1770_v34 = vpop.permute.xlu0 %1769 }
 0x7b7   : > { %v1772_v35 = vadd.f32 %v1770_v34, %v1768_v32 }
 0x7b9   : > { %v1776_v37 = vadd.f32 %v1774_v33, %v1772_v35 }
 0x7ba   : > { %v916_v38 = vpop.permute.xlu1 %915  ;;  %v1778_v39 = vpop.permute.xlu0 %1777 }
 0x7bb   : > { %v918_v40 = vsel %vm619_vm2, %v2866_v36, %v916_v38  ;;  %v1780_v41 = vadd.f32 %v1778_v39, %v1776_v37 }
 0x7bc   : > { %919 = vst [vmem:[%s577_s26] sm:$0xf] %v918_v40 }
 0x7bd   : > { %v1781_v42 = vmul.f32 0.015625, %v1780_v41 }
 0x7bf   : > { %1783 = vst.msk [vmem:[%s553_s17] sm:$0x1] %vm1782_vm13, %v1781_v42 }
 0x7c0   : > { %2527 = shalt.err (!%p2524_p0)
}
 0x7c1   : > { %s2528_s26 = scalar_lea.hbm %s1854_s27, 16  ;;  %s2532_s17 = scalar_lea.hbm %s3008_s15, 32 }
 0x7c2   : > { %p2529_p1 = scmp.ne.s32.totalorder %s1854_s27, %s2528_s26  ;;  %p2533_p4 = scmp.lt.s32.totalorder %s1854_s27, %s3008_s15 }
 0x7c3   : > { %p2534_p7 = scmp.lt.s32.totalorder %s2532_s17, %s2528_s26 }
 0x7c4   : > { %p2530_p2 = pnand %p2529_p1, %p2718_p5 }
 0x7c5   : > { %p2535_p8 = por %p2534_p7, %p2533_p4 }
 0x7c6   : > { %p2531_p3 = pneg %p2530_p2 }
 0x7c8   : > { %p2536_p6 = pnand %p2535_p8, %p2531_p3 }
 0x7ca   : > { %2539 = shalt.err (!%p2536_p6)
}
 0x7cb   : > { %2323 = dma.vmem_to_hbm [thread:$0]  (%p2718_p5), %s1857_s25, 16, %s1854_s27, %s1820_s30  }
 0x7cc PF: > { %p2335_p9 = scmp.ge.s32.totalorder %s2578_s21, 2  ;;  %s1927_s23 = sand.u32 1, %s2566_s18  }
 0x7cd   : > { %p3033_p10 = scmp.ne.s32.totalorder %s3024_s29, 0  ;;  %s1928_s22 = scalar_lea.sflag [#allocation4], %s1927_s23 }
 0x7cf   : > { %p2330_p11 = pnand %p2335_p9, %p3033_p10 }
 0x7d1   : > { %p2331_p12 = pneg %p2330_p11 }
 0x7d3   : > { %2561 = dma.done.wait (%p2331_p12), %s1928_s22, 16  }
 0x7d4   : > { %2563 = vsyncadd (%p2331_p12), %s1928_s22, 4294967280  ;;  %s3034_s21 = sld [smem:[#allocation9_spill]]  ;;  %s3037_s18 = smov %s2570_s19 }
 0x7d5   : > { %s3035_s5 = sld [smem:[#allocation8_spill]] }
 0x7d6   : > { %s3036_s20 = sld [smem:[#allocation10_spill]] }
 0x7da   : > { %p27_p13 = scmp.ge.s32.totalorder %s3034_s21, 4  }
 0x7db   : > { %s3038_s19 = smov %s3035_s5 }
 0x7dc   :  { %29 = sbr.rel (!%p27_p13) target bundleno = 8 (0x8), region = 190 }
 0x7e1   :  { %1932 = vsyncpa [#allocation3], 1 }
 0x7e2   :  { %1934 = vsyncpa [#allocation3 + $0x1], 1 }
 0x7e3   :  { %1935 = vsyncpa [#allocation4], 1 }
 0x7e4   :  { %1937 = vsyncpa [#allocation4 + $0x1], 1 }

</bundles_post_ra>
